<compile_context>
chip_gen: v6e
topology: v6e:2x2x1
jax: 0.10.0
libtpu: 0.0.40
codegen_flags: <defaults>
</compile_context>

<pallas_src>
import functools
import math

import jax
import jax.numpy as jnp
from jax.experimental import pallas as pl
from jax.experimental.pallas import tpu as pltpu

F32 = jnp.float32

# ---- synthetic net_params (small, consistent with the module) ----
NUM_ATOM_TYPE = 8
EMBED_DIM = 32            # embedding_dim == hidden_dim
HIDDEN_DIM = 32
OUT_DIM = 32
NUM_HEADS = 4
HEAD_DIM = HIDDEN_DIM // NUM_HEADS
NUM_LAYERS = 2            # L
RBF_BINS = 40
RBF_VMIN, RBF_VMAX = 0.0, 8.0
RBF_GAMMA = 1.0 / ((RBF_VMAX - RBF_VMIN) / (RBF_BINS - 1))
SLAB_COLS = 128
# readout='mean', layer_norm=True, batch_norm=False, residual=True,
# edge_feat=True, soap=False, dropouts=0 (inference)

assert HIDDEN_DIM % NUM_HEADS == 0 and (HEAD_DIM & (HEAD_DIM - 1)) == 0


# --------------------------- static slab layouts ---------------------------

def _make_w_layout():
    layout, r = {}, 0

    def add(name, nr, nc):
        nonlocal r
        layout[name] = (r, nr, nc)
        r += nr

    add("emb", NUM_ATOM_TYPE, HIDDEN_DIM)
    add("rbf1", RBF_BINS, HIDDEN_DIM)
    add("rbf2", HIDDEN_DIM, HIDDEN_DIM)
    for l in range(NUM_LAYERS):
        add(f"qkve{l}", HIDDEN_DIM, 4 * HIDDEN_DIM)       # [Q|K|V|E]
        add(f"o{l}", HIDDEN_DIM, 2 * HIDDEN_DIM)          # [O_h|O_e]
        add(f"f1{l}", HIDDEN_DIM, 4 * HIDDEN_DIM)         # [ffn_h1|ffn_e1]
        add(f"f2{l}", 4 * HIDDEN_DIM, 2 * HIDDEN_DIM)     # blockdiag(ffn_h2, ffn_e2)
    add("m1", OUT_DIM, OUT_DIM // 2)
    add("m2", OUT_DIM // 2, OUT_DIM // 4)
    add("m3", OUT_DIM // 4, 1)
    return layout, ((r + 7) // 8) * 8


def _make_v_layout():
    layout, r = {}, 0

    def add(name, nc):
        nonlocal r
        layout[name] = (r, nc)
        r += 1

    add("emb_b", HIDDEN_DIM)
    add("rbf1_b", HIDDEN_DIM)
    add("rbf2_b", HIDDEN_DIM)
    for l in range(NUM_LAYERS):
        add(f"o_b{l}", 2 * HIDDEN_DIM)        # [O_h_b | O_e_b]
        add(f"ln1_g{l}", 2 * HIDDEN_DIM)      # [g_h | g_e]
        add(f"ln1_b{l}", 2 * HIDDEN_DIM)
        add(f"f1_b{l}", 4 * HIDDEN_DIM)       # [ffn_h1_b | ffn_e1_b]
        add(f"f2_b{l}", 2 * HIDDEN_DIM)       # [ffn_h2_b | ffn_e2_b]
        add(f"ln2_g{l}", 2 * HIDDEN_DIM)
        add(f"ln2_b{l}", 2 * HIDDEN_DIM)
    add("m1_b", OUT_DIM // 2)
    add("m2_b", OUT_DIM // 4)
    add("m3_b", 1)
    return layout, ((r + 7) // 8) * 8


W_OFF, W_ROWS = _make_w_layout()
V_OFF, V_ROWS = _make_v_layout()


# --------------------------- small helpers ---------------------------

def _dot(a, b):
    return jnp.dot(a, b, preferred_element_type=jnp.float32)


def _layer_norm(x, g, b, eps=1e-5):
    mu = jnp.mean(x, axis=-1, keepdims=True)
    var = jnp.mean((x - mu) ** 2, axis=-1, keepdims=True)
    return (x - mu) * jax.lax.rsqrt(var + eps) * g + b


def _softplus(x):
    # Stable softplus from exp/log/abs/max only (Mosaic-friendly lowering).
    return jnp.maximum(x, 0.0) + jnp.log(1.0 + jnp.exp(-jnp.abs(x)))


# --------------------------- the single fused kernel ---------------------------

def _forward_kernel(n_nodes, n_edges,
                    h_atom_ref, lh_ref, src_ref, dst_ref, w_ref, v_ref, out_ref):
    HD = HIDDEN_DIM
    R = n_nodes + n_edges

    def w_at(name):                                   # static ref slice -> small load
        r, nr, nc = W_OFF[name]
        return w_ref[r:r + nr, 0:nc]

    def v_at(name):                                   # [1, nc] vector
        r, nc = V_OFF[name]
        return v_ref[r:r + 1, 0:nc]

    h_atom = h_atom_ref[0]                            # [N, A]
    lh = lh_ref[0]                                    # [E, 1]
    src_ids = src_ref[0]                              # [E, 1] int32
    dst_ids = dst_ref[0]                              # [E, 1] int32

    # One-hot gather/scatter operands built in-kernel (VPU iota compares, no HBM).
    col_n = jax.lax.broadcasted_iota(jnp.int32, (n_edges, n_nodes), 1)
    src_oh = (src_ids == col_n).astype(F32)           # [E, N]
    dst_oh = (dst_ids == col_n).astype(F32)           # [E, N]

    # Per-head block-sum matrix (same head <=> same aligned power-of-2 block of 8).
    hi = jax.lax.broadcasted_iota(jnp.int32, (HD, HD), 0)
    hj = jax.lax.broadcasted_iota(jnp.int32, (HD, HD), 1)
    head_block = ((hi ^ hj) < HEAD_DIM).astype(F32)   # [HD, HD]

    # RBF centers = linspace(vmin, vmax, bins), built with iota.
    rbf_step = (RBF_VMAX - RBF_VMIN) / (RBF_BINS - 1)
    centers = (RBF_VMIN + rbf_step *
               jax.lax.broadcasted_iota(jnp.int32, (1, RBF_BINS), 1).astype(F32))

    # Row mask: rows [0, N) are node rows, rows [N, N+E) are edge rows.
    node_rows = jax.lax.broadcasted_iota(jnp.int32, (R, 1), 0) < n_nodes

    inv_sqrt_d = 1.0 / math.sqrt(HEAD_DIM)

    # ---- node embedding (in_feat_dropout = identity at inference) ----
    h = _dot(h_atom, w_at("emb")) + v_at("emb_b")                     # [N, HD]

    # ---- e = rbf(lh): RBFExpansion -> Linear -> Softplus -> Linear ----
    rbf = jnp.exp(-RBF_GAMMA * (lh - centers) ** 2)                   # [E, bins]
    e = _softplus(_dot(rbf, w_at("rbf1")) + v_at("rbf1_b"))
    e = _dot(e, w_at("rbf2")) + v_at("rbf2_b")                        # [E, HD]

    # Persistent stacked buffer for the whole layer stack: [h-rows ; e-rows].
    x = jnp.concatenate([h, e], axis=0)                               # [R, HD]

    for l in range(NUM_LAYERS):
        x_in1 = x

        # fused Q|K|V|proj_e projection: one lane-dense [R, 128] MXU matmul (no bias)
        slab = _dot(x, w_at(f"qkve{l}"))                              # [R, 4*HD]
        q = slab[:n_nodes, 0:HD]                                      # [N, HD]
        kv = slab[:n_nodes, HD:3 * HD]                                # [N, 2*HD]  K|V
        pe = slab[n_nodes:, 3 * HD:4 * HD]                            # [E, HD]

        # fused gathers: one matmul for q_dst, one for k|v from the source nodes
        q_dst = _dot(dst_oh, q)                                       # [E, HD]
        kv_src = _dot(src_oh, kv)                                     # [E, 2*HD]
        k_src = kv_src[:, 0:HD]
        v_src = kv_src[:, HD:2 * HD]

        # per-edge attention, heads packed along lanes; e_out = score
        score = k_src * q_dst * inv_sqrt_d * pe                       # [E, HD]
        s_full = jnp.clip(_dot(score, head_block), -5.0, 5.0)         # per-head sums
        a_full = jnp.exp(s_full)                                      # [E, HD]

        # fused scatter: numerator | normalizer in one matmul, edge axis contracted
        aw = jnp.concatenate([a_full * v_src, a_full], axis=1)        # [E, 2*HD]
        nm = jax.lax.dot_general(dst_oh, aw, (((0,), (0,)), ((), ())),
                                 preferred_element_type=jnp.float32)  # [N, 2*HD]
        h_att = nm[:, 0:HD] * pl.reciprocal(nm[:, HD:2 * HD] + 1e-6, approx=True)

        # fused O_h|O_e projection + residual
        att = jnp.concatenate([h_att, score], axis=0)                 # [R, HD]
        o_out = _dot(att, w_at(f"o{l}"))                              # [R, 2*HD]
        o_b = v_at(f"o_b{l}")
        x = x_in1 + jnp.where(node_rows,
                              o_out[:, 0:HD] + o_b[:, 0:HD],
                              o_out[:, HD:2 * HD] + o_b[:, HD:2 * HD])

        g1 = v_at(f"ln1_g{l}")
        b1 = v_at(f"ln1_b{l}")
        x = _layer_norm(x,
                        jnp.where(node_rows, g1[:, 0:HD], g1[:, HD:2 * HD]),
                        jnp.where(node_rows, b1[:, 0:HD], b1[:, HD:2 * HD]))

        # fused FFN: lane-concat first layer, block-diagonal second layer
        x_in2 = x
        f1 = jnp.maximum(_dot(x, w_at(f"f1{l}")) + v_at(f"f1_b{l}"), 0.0)   # [R, 4*HD]
        f2 = _dot(f1, w_at(f"f2{l}"))                                       # [R, 2*HD]
        f2b = v_at(f"f2_b{l}")
        ffn = jnp.where(node_rows,
                        f2[:, 0:HD] + f2b[:, 0:HD],
                        f2[:, HD:2 * HD] + f2b[:, HD:2 * HD])

        g2 = v_at(f"ln2_g{l}")
        b2 = v_at(f"ln2_b{l}")
        x = _layer_norm(x_in2 + ffn,
                        jnp.where(node_rows, g2[:, 0:HD], g2[:, HD:2 * HD]),
                        jnp.where(node_rows, b2[:, 0:HD], b2[:, HD:2 * HD]))

    # ---- readout: mean over node rows, then MLPReadout (32 -> 16 -> 8 -> 1) ----
    hg = jnp.mean(x[:n_nodes, :], axis=0, keepdims=True)              # [1, HD]
    y = jnp.maximum(_dot(hg, w_at("m1")) + v_at("m1_b"), 0.0)
    y = jnp.maximum(_dot(y, w_at("m2")) + v_at("m2_b"), 0.0)
    y = _dot(y, w_at("m3")) + v_at("m3_b")                            # [1, 1]
    out_ref[0] = y.astype(out_ref.dtype)


# --------------------------- parameters ---------------------------

def _init_linear(key, fan_in, fan_out, bias=True):
    kw, kb = jax.random.split(key)
    bound = 1.0 / math.sqrt(fan_in)
    w = jax.random.uniform(kw, (fan_in, fan_out), F32, -bound, bound)
    if bias:
        b = jax.random.uniform(kb, (1, fan_out), F32, -bound, bound)
    else:
        b = jnp.zeros((1, fan_out), F32)
    return w, b


def _ln_params(dim):
    return jnp.ones((1, dim), F32), jnp.zeros((1, dim), F32)


def init_params(key):
    keys = iter(jax.random.split(key, 64))
    p = {}
    p["embedding_h"] = _init_linear(next(keys), NUM_ATOM_TYPE, EMBED_DIM)
    p["rbf_lin1"] = _init_linear(next(keys), RBF_BINS, EMBED_DIM)
    p["rbf_lin2"] = _init_linear(next(keys), EMBED_DIM, EMBED_DIM)
    layers = []
    for _ in range(NUM_LAYERS):
        lp = {}
        lp["Q"] = _init_linear(next(keys), HIDDEN_DIM, HIDDEN_DIM, bias=False)[0]
        lp["K"] = _init_linear(next(keys), HIDDEN_DIM, HIDDEN_DIM, bias=False)[0]
        lp["V"] = _init_linear(next(keys), HIDDEN_DIM, HIDDEN_DIM, bias=False)[0]
        lp["E"] = _init_linear(next(keys), HIDDEN_DIM, HIDDEN_DIM, bias=False)[0]
        lp["O_h"] = _init_linear(next(keys), HIDDEN_DIM, HIDDEN_DIM)
        lp["O_e"] = _init_linear(next(keys), HIDDEN_DIM, HIDDEN_DIM)
        lp["ln1_h"] = _ln_params(HIDDEN_DIM)
        lp["ln1_e"] = _ln_params(HIDDEN_DIM)
        lp["ffn_h1"] = _init_linear(next(keys), HIDDEN_DIM, 2 * HIDDEN_DIM)
        lp["ffn_h2"] = _init_linear(next(keys), 2 * HIDDEN_DIM, HIDDEN_DIM)
        lp["ffn_e1"] = _init_linear(next(keys), HIDDEN_DIM, 2 * HIDDEN_DIM)
        lp["ffn_e2"] = _init_linear(next(keys), 2 * HIDDEN_DIM, HIDDEN_DIM)
        lp["ln2_h"] = _ln_params(HIDDEN_DIM)
        lp["ln2_e"] = _ln_params(HIDDEN_DIM)
        layers.append(lp)
    p["layers"] = layers
    p["mlp"] = [
        _init_linear(next(keys), OUT_DIM, OUT_DIM // 2),
        _init_linear(next(keys), OUT_DIM // 2, OUT_DIM // 4),
        _init_linear(next(keys), OUT_DIM // 4, 1),
    ]
    return p


def pack_params(p):
    """Pack all weights / vectors into two (rows, 128) f32 slabs (host-side)."""
    w = jnp.zeros((W_ROWS, SLAB_COLS), F32)
    v = jnp.zeros((V_ROWS, SLAB_COLS), F32)

    def put_w(w, name, arr):
        r, nr, nc = W_OFF[name]
        assert arr.shape == (nr, nc), (name, arr.shape, (nr, nc))
        return w.at[r:r + nr, 0:nc].set(arr)

    def put_v(v, name, arr):
        r, nc = V_OFF[name]
        arr = arr.reshape(1, -1)
        assert arr.shape == (1, nc), (name, arr.shape, nc)
        return v.at[r:r + 1, 0:nc].set(arr)

    w = put_w(w, "emb", p["embedding_h"][0]);   v = put_v(v, "emb_b", p["embedding_h"][1])
    w = put_w(w, "rbf1", p["rbf_lin1"][0]);     v = put_v(v, "rbf1_b", p["rbf_lin1"][1])
    w = put_w(w, "rbf2", p["rbf_lin2"][0]);     v = put_v(v, "rbf2_b", p["rbf_lin2"][1])
    for l, lp in enumerate(p["layers"]):
        w = put_w(w, f"qkve{l}",
                  jnp.concatenate([lp["Q"], lp["K"], lp["V"], lp["E"]], axis=1))
        w = put_w(w, f"o{l}", jnp.concatenate([lp["O_h"][0], lp["O_e"][0]], axis=1))
        v = put_v(v, f"o_b{l}", jnp.concatenate([lp["O_h"][1], lp["O_e"][1]], axis=1))
        v = put_v(v, f"ln1_g{l}", jnp.concatenate([lp["ln1_h"][0], lp["ln1_e"][0]], axis=1))
        v = put_v(v, f"ln1_b{l}", jnp.concatenate([lp["ln1_h"][1], lp["ln1_e"][1]], axis=1))
        w = put_w(w, f"f1{l}", jnp.concatenate([lp["ffn_h1"][0], lp["ffn_e1"][0]], axis=1))
        v = put_v(v, f"f1_b{l}", jnp.concatenate([lp["ffn_h1"][1], lp["ffn_e1"][1]], axis=1))
        f2 = jnp.zeros((4 * HIDDEN_DIM, 2 * HIDDEN_DIM), F32)
        f2 = f2.at[0:2 * HIDDEN_DIM, 0:HIDDEN_DIM].set(lp["ffn_h2"][0])
        f2 = f2.at[2 * HIDDEN_DIM:, HIDDEN_DIM:].set(lp["ffn_e2"][0])
        w = put_w(w, f"f2{l}", f2)
        v = put_v(v, f"f2_b{l}", jnp.concatenate([lp["ffn_h2"][1], lp["ffn_e2"][1]], axis=1))
        v = put_v(v, f"ln2_g{l}", jnp.concatenate([lp["ln2_h"][0], lp["ln2_e"][0]], axis=1))
        v = put_v(v, f"ln2_b{l}", jnp.concatenate([lp["ln2_h"][1], lp["ln2_e"][1]], axis=1))
    (m1w, m1b), (m2w, m2b), (m3w, m3b) = p["mlp"]
    w = put_w(w, "m1", m1w); v = put_v(v, "m1_b", m1b)
    w = put_w(w, "m2", m2w); v = put_v(v, "m2_b", m2b)
    w = put_w(w, "m3", m3w); v = put_v(v, "m3_b", m3b)
    return w, v


# --------------------------- wrapper ---------------------------

def graph_transformer_net_forward(w_slab, v_slab, h_atom, lh, src, dst):
    """h_atom: [B,N,A] f32, lh: [B,E] f32, src/dst: [B,E] int -> [B,1] f32."""
    batch, n_nodes, _ = h_atom.shape
    n_edges = src.shape[1]

    lh3 = lh.reshape(batch, n_edges, 1).astype(F32)
    src3 = src.reshape(batch, n_edges, 1).astype(jnp.int32)
    dst3 = dst.reshape(batch, n_edges, 1).astype(jnp.int32)

    kernel = functools.partial(_forward_kernel, n_nodes, n_edges)
    out = pl.pallas_call(
        kernel,
        out_shape=jax.ShapeDtypeStruct((batch, 1, 1), F32),
        grid=(batch,),
        in_specs=[
            pl.BlockSpec((1, n_nodes, NUM_ATOM_TYPE), lambda b: (b, 0, 0)),
            pl.BlockSpec((1, n_edges, 1), lambda b: (b, 0, 0)),
            pl.BlockSpec((1, n_edges, 1), lambda b: (b, 0, 0)),
            pl.BlockSpec((1, n_edges, 1), lambda b: (b, 0, 0)),
            pl.BlockSpec(w_slab.shape, lambda b: (0, 0)),   # resident across grid
            pl.BlockSpec(v_slab.shape, lambda b: (0, 0)),   # resident across grid
        ],
        out_specs=pl.BlockSpec((1, 1, 1), lambda b: (b, 0, 0)),
        compiler_params=pltpu.CompilerParams(
            dimension_semantics=("parallel",)),
    )(h_atom, lh3, src3, dst3, w_slab, v_slab)
    return out.reshape(batch, 1)


# --------------------------- main ---------------------------

if __name__ == "__main__":
    key = jax.random.PRNGKey(0)
    kp, kh, kd = jax.random.split(key, 3)

    BATCH, N_NODES, N_EDGES = 2, 16, 32
    idx = jnp.arange(N_NODES)
    src1 = jnp.concatenate([idx, idx])                     # each node -> (i+1), (i+2)
    dst1 = jnp.concatenate([(idx + 1) % N_NODES, (idx + 2) % N_NODES])
    src = jnp.stack([src1] * BATCH)                        # [B, E]
    dst = jnp.stack([dst1] * BATCH)

    h_atom = jax.random.normal(kh, (BATCH, N_NODES, NUM_ATOM_TYPE), F32)
    lh = jax.random.uniform(kd, (BATCH, N_EDGES), F32, 0.5, 7.5)   # bond distances

    params = init_params(kp)
    w_slab, v_slab = pack_params(params)

    fwd = jax.jit(graph_transformer_net_forward)
    out = jax.block_until_ready(fwd(w_slab, v_slab, h_atom, lh, src, dst))
    assert out.shape == (BATCH, 1) and out.dtype == jnp.float32
    assert bool(jnp.all(jnp.isfinite(out)))
    print("KERNEL_OK")
</pallas_src>

<mosaic_0001>
module attributes {stable_mosaic.version = 11 : i64} {
  func.func @_forward_kernel(%arg0: i32, %arg1: memref<1x16x8xf32, #tpu.memory_space<vmem>>, %arg2: memref<1x32x1xf32, #tpu.memory_space<vmem>>, %arg3: memref<1x32x1xi32, #tpu.memory_space<vmem>>, %arg4: memref<1x32x1xi32, #tpu.memory_space<vmem>>, %arg5: memref<584x128xf32, #tpu.memory_space<vmem>>, %arg6: memref<24x128xf32, #tpu.memory_space<vmem>>, %arg7: memref<1x1x1xf32, #tpu.memory_space<vmem>>) attributes {dimension_semantics = [#tpu.dimension_semantics<parallel>], iteration_bounds = array<i64: 2>, scalar_prefetch = 0 : i64, scratch_operands = 0 : i64, tpu.core_type = #tpu.core_type<tc>, window_params = [{transform_indices = @transform_0, window_bounds = array<i64: 1, 16, 8>}, {transform_indices = @transform_1, window_bounds = array<i64: 1, 32, 1>}, {transform_indices = @transform_2, window_bounds = array<i64: 1, 32, 1>}, {transform_indices = @transform_3, window_bounds = array<i64: 1, 32, 1>}, {pipeline_mode = #tpu.pipeline_mode<synchronous>, transform_indices = @transform_4, window_bounds = array<i64: 584, 128>}, {pipeline_mode = #tpu.pipeline_mode<synchronous>, transform_indices = @transform_5, window_bounds = array<i64: 24, 128>}, {transform_indices = @transform_6, window_bounds = array<i64: 1, 1, 1>}]} {
    %c0 = arith.constant 0 : index
    %c0_0 = arith.constant 0 : index
    %c0_1 = arith.constant 0 : index
    %0 = vector.load %arg1[%c0, %c0_0, %c0_1] : memref<1x16x8xf32, #tpu.memory_space<vmem>>, vector<1x16x8xf32>
    %1 = vector.shape_cast %0 : vector<1x16x8xf32> to vector<16x8xf32>
    %c0_2 = arith.constant 0 : index
    %c0_3 = arith.constant 0 : index
    %c0_4 = arith.constant 0 : index
    %2 = vector.load %arg2[%c0_2, %c0_3, %c0_4] : memref<1x32x1xf32, #tpu.memory_space<vmem>>, vector<1x32x1xf32>
    %3 = vector.shape_cast %2 : vector<1x32x1xf32> to vector<32x1xf32>
    %c0_5 = arith.constant 0 : index
    %c0_6 = arith.constant 0 : index
    %c0_7 = arith.constant 0 : index
    %4 = vector.load %arg3[%c0_5, %c0_6, %c0_7] : memref<1x32x1xi32, #tpu.memory_space<vmem>>, vector<1x32x1xi32>
    %5 = vector.shape_cast %4 : vector<1x32x1xi32> to vector<32x1xi32>
    %c0_8 = arith.constant 0 : index
    %c0_9 = arith.constant 0 : index
    %c0_10 = arith.constant 0 : index
    %6 = vector.load %arg4[%c0_8, %c0_9, %c0_10] : memref<1x32x1xi32, #tpu.memory_space<vmem>>, vector<1x32x1xi32>
    %7 = vector.shape_cast %6 : vector<1x32x1xi32> to vector<32x1xi32>
    %8 = tpu.iota {dimensions = array<i32: 1>} : vector<32x16xi32>
    %9 = vector.broadcast %5 : vector<32x1xi32> to vector<32x16xi32>
    %10 = arith.cmpi eq, %9, %8 : vector<32x16xi32>
    %11 = arith.extui %10 : vector<32x16xi1> to vector<32x16xi32>
    %12 = arith.sitofp %11 : vector<32x16xi32> to vector<32x16xf32>
    %13 = vector.broadcast %7 : vector<32x1xi32> to vector<32x16xi32>
    %14 = arith.cmpi eq, %13, %8 : vector<32x16xi32>
    %15 = arith.extui %14 : vector<32x16xi1> to vector<32x16xi32>
    %16 = arith.sitofp %15 : vector<32x16xi32> to vector<32x16xf32>
    %17 = tpu.iota {dimensions = array<i32: 0>} : vector<32x32xi32>
    %18 = tpu.iota {dimensions = array<i32: 1>} : vector<32x32xi32>
    %19 = arith.xori %17, %18 : vector<32x32xi32>
    %c8_i32 = arith.constant 8 : i32
    %20 = vector.broadcast %c8_i32 : i32 to vector<32x32xi32>
    %21 = arith.cmpi slt, %19, %20 : vector<32x32xi32>
    %22 = arith.extui %21 : vector<32x32xi1> to vector<32x32xi32>
    %23 = arith.sitofp %22 : vector<32x32xi32> to vector<32x32xf32>
    %24 = tpu.iota {dimensions = array<i32: 1>} : vector<1x40xi32>
    %25 = arith.sitofp %24 : vector<1x40xi32> to vector<1x40xf32>
    %cst = arith.constant 0.205128208 : f32
    %26 = vector.broadcast %cst : f32 to vector<1x40xf32>
    %27 = arith.mulf %26, %25 : vector<1x40xf32>
    %cst_11 = arith.constant 0.000000e+00 : f32
    %28 = vector.broadcast %cst_11 : f32 to vector<1x40xf32>
    %29 = arith.addf %28, %27 : vector<1x40xf32>
    %30 = tpu.iota {dimensions = array<i32: 0>} : vector<48x1xi32>
    %c16_i32 = arith.constant 16 : i32
    %31 = vector.broadcast %c16_i32 : i32 to vector<48x1xi32>
    %32 = arith.cmpi slt, %30, %31 : vector<48x1xi32>
    %c0_12 = arith.constant 0 : index
    %c0_13 = arith.constant 0 : index
    %33 = vector.load %arg5[%c0_12, %c0_13] : memref<584x128xf32, #tpu.memory_space<vmem>>, vector<8x32xf32>
    %cst_14 = arith.constant dense<0.000000e+00> : vector<16x32xf32>
    %34 = tpu.matmul %1, %33, %cst_14 {dimension_numbers = #tpu.dot_dimension_numbers<[1], [0], [0], [1], [0, 0, 1, 1], [], []>} : vector<16x8xf32>, vector<8x32xf32>, vector<16x32xf32> -> vector<16x32xf32>
    %c0_15 = arith.constant 0 : index
    %c0_16 = arith.constant 0 : index
    %35 = vector.load %arg6[%c0_15, %c0_16] : memref<24x128xf32, #tpu.memory_space<vmem>>, vector<1x32xf32>
    %36 = vector.broadcast %35 : vector<1x32xf32> to vector<16x32xf32>
    %37 = arith.addf %34, %36 : vector<16x32xf32>
    %38 = vector.broadcast %3 : vector<32x1xf32> to vector<32x40xf32>
    %39 = vector.broadcast %29 : vector<1x40xf32> to vector<32x40xf32>
    %40 = arith.subf %38, %39 : vector<32x40xf32>
    %41 = arith.mulf %40, %40 : vector<32x40xf32>
    %cst_17 = arith.constant -4.875000e+00 : f32
    %42 = vector.broadcast %cst_17 : f32 to vector<32x40xf32>
    %43 = arith.mulf %42, %41 : vector<32x40xf32>
    %44 = math.exp %43 : vector<32x40xf32>
    %c8 = arith.constant 8 : index
    %c0_18 = arith.constant 0 : index
    %45 = vector.load %arg5[%c8, %c0_18] : memref<584x128xf32, #tpu.memory_space<vmem>>, vector<40x32xf32>
    %cst_19 = arith.constant dense<0.000000e+00> : vector<32x32xf32>
    %46 = tpu.matmul %44, %45, %cst_19 {dimension_numbers = #tpu.dot_dimension_numbers<[1], [0], [0], [1], [0, 0, 1, 1], [], []>} : vector<32x40xf32>, vector<40x32xf32>, vector<32x32xf32> -> vector<32x32xf32>
    %c1 = arith.constant 1 : index
    %c0_20 = arith.constant 0 : index
    %47 = vector.load %arg6[%c1, %c0_20] : memref<24x128xf32, #tpu.memory_space<vmem>>, vector<1x32xf32>
    %48 = vector.broadcast %47 : vector<1x32xf32> to vector<32x32xf32>
    %49 = arith.addf %46, %48 : vector<32x32xf32>
    %cst_21 = arith.constant 0.000000e+00 : f32
    %50 = vector.broadcast %cst_21 : f32 to vector<32x32xf32>
    %51 = arith.maximumf %49, %50 : vector<32x32xf32>
    %52 = math.absf %49 : vector<32x32xf32>
    %cst_22 = arith.constant 0.000000e+00 : f32
    %53 = vector.broadcast %cst_22 : f32 to vector<32x32xf32>
    %54 = arith.subf %53, %52 : vector<32x32xf32>
    %55 = math.exp %54 : vector<32x32xf32>
    %cst_23 = arith.constant 1.000000e+00 : f32
    %56 = vector.broadcast %cst_23 : f32 to vector<32x32xf32>
    %57 = arith.addf %56, %55 : vector<32x32xf32>
    %58 = math.log %57 : vector<32x32xf32>
    %59 = arith.addf %51, %58 : vector<32x32xf32>
    %c48 = arith.constant 48 : index
    %c0_24 = arith.constant 0 : index
    %60 = vector.load %arg5[%c48, %c0_24] : memref<584x128xf32, #tpu.memory_space<vmem>>, vector<32x32xf32>
    %cst_25 = arith.constant dense<0.000000e+00> : vector<32x32xf32>
    %61 = tpu.matmul %59, %60, %cst_25 {dimension_numbers = #tpu.dot_dimension_numbers<[1], [0], [0], [1], [0, 0, 1, 1], [], []>} : vector<32x32xf32>, vector<32x32xf32>, vector<32x32xf32> -> vector<32x32xf32>
    %c2 = arith.constant 2 : index
    %c0_26 = arith.constant 0 : index
    %62 = vector.load %arg6[%c2, %c0_26] : memref<24x128xf32, #tpu.memory_space<vmem>>, vector<1x32xf32>
    %63 = vector.broadcast %62 : vector<1x32xf32> to vector<32x32xf32>
    %64 = arith.addf %61, %63 : vector<32x32xf32>
    %65 = tpu.concatenate %37, %64 in 0 : vector<16x32xf32>, vector<32x32xf32> -> vector<48x32xf32>
    %c80 = arith.constant 80 : index
    %c0_27 = arith.constant 0 : index
    %66 = vector.load %arg5[%c80, %c0_27] : memref<584x128xf32, #tpu.memory_space<vmem>>, vector<32x128xf32>
    %cst_28 = arith.constant dense<0.000000e+00> : vector<48x128xf32>
    %67 = tpu.matmul %65, %66, %cst_28 {dimension_numbers = #tpu.dot_dimension_numbers<[1], [0], [0], [1], [0, 0, 1, 1], [], []>} : vector<48x32xf32>, vector<32x128xf32>, vector<48x128xf32> -> vector<48x128xf32>
    %68 = vector.extract_strided_slice %67 {offsets = [0, 0], sizes = [16, 32], strides = [1, 1]} : vector<48x128xf32> to vector<16x32xf32>
    %69 = vector.extract_strided_slice %67 {offsets = [0, 32], sizes = [16, 64], strides = [1, 1]} : vector<48x128xf32> to vector<16x64xf32>
    %70 = vector.extract_strided_slice %67 {offsets = [16, 96], sizes = [32, 32], strides = [1, 1]} : vector<48x128xf32> to vector<32x32xf32>
    %cst_29 = arith.constant dense<0.000000e+00> : vector<32x32xf32>
    %71 = tpu.matmul %16, %68, %cst_29 {dimension_numbers = #tpu.dot_dimension_numbers<[1], [0], [0], [1], [0, 0, 1, 1], [], []>} : vector<32x16xf32>, vector<16x32xf32>, vector<32x32xf32> -> vector<32x32xf32>
    %cst_30 = arith.constant dense<0.000000e+00> : vector<32x64xf32>
    %72 = tpu.matmul %12, %69, %cst_30 {dimension_numbers = #tpu.dot_dimension_numbers<[1], [0], [0], [1], [0, 0, 1, 1], [], []>} : vector<32x16xf32>, vector<16x64xf32>, vector<32x64xf32> -> vector<32x64xf32>
    %73 = vector.extract_strided_slice %72 {offsets = [0, 0], sizes = [32, 32], strides = [1, 1]} : vector<32x64xf32> to vector<32x32xf32>
    %74 = vector.extract_strided_slice %72 {offsets = [0, 32], sizes = [32, 32], strides = [1, 1]} : vector<32x64xf32> to vector<32x32xf32>
    %75 = arith.mulf %73, %71 : vector<32x32xf32>
    %cst_31 = arith.constant 0.353553385 : f32
    %76 = vector.broadcast %cst_31 : f32 to vector<32x32xf32>
    %77 = arith.mulf %75, %76 : vector<32x32xf32>
    %78 = arith.mulf %77, %70 : vector<32x32xf32>
    %cst_32 = arith.constant dense<0.000000e+00> : vector<32x32xf32>
    %79 = tpu.matmul %78, %23, %cst_32 {dimension_numbers = #tpu.dot_dimension_numbers<[1], [0], [0], [1], [0, 0, 1, 1], [], []>} : vector<32x32xf32>, vector<32x32xf32>, vector<32x32xf32> -> vector<32x32xf32>
    %cst_33 = arith.constant -5.000000e+00 : f32
    %cst_34 = arith.constant 5.000000e+00 : f32
    %80 = vector.broadcast %cst_33 : f32 to vector<32x32xf32>
    %81 = arith.maximumf %80, %79 : vector<32x32xf32>
    %82 = vector.broadcast %cst_34 : f32 to vector<32x32xf32>
    %83 = arith.minimumf %82, %81 : vector<32x32xf32>
    %84 = math.exp %83 : vector<32x32xf32>
    %85 = arith.mulf %84, %74 : vector<32x32xf32>
    %86 = tpu.concatenate %85, %84 in 1 : vector<32x32xf32>, vector<32x32xf32> -> vector<32x64xf32>
    %cst_35 = arith.constant dense<0.000000e+00> : vector<16x64xf32>
    %87 = tpu.matmul %16, %86, %cst_35 {dimension_numbers = #tpu.dot_dimension_numbers<[0], [0], [1], [1], [0, 1, 1, 1], [], []>} : vector<32x16xf32>, vector<32x64xf32>, vector<16x64xf32> -> vector<16x64xf32>
    %88 = vector.extract_strided_slice %87 {offsets = [0, 0], sizes = [16, 32], strides = [1, 1]} : vector<16x64xf32> to vector<16x32xf32>
    %89 = vector.extract_strided_slice %87 {offsets = [0, 32], sizes = [16, 32], strides = [1, 1]} : vector<16x64xf32> to vector<16x32xf32>
    %cst_36 = arith.constant 9.99999997E-7 : f32
    %90 = vector.broadcast %cst_36 : f32 to vector<16x32xf32>
    %91 = arith.addf %89, %90 : vector<16x32xf32>
    %92 = tpu.reciprocal %91 {approx = true} : vector<16x32xf32> -> vector<16x32xf32>
    %93 = arith.mulf %88, %92 : vector<16x32xf32>
    %94 = tpu.concatenate %93, %78 in 0 : vector<16x32xf32>, vector<32x32xf32> -> vector<48x32xf32>
    %c112 = arith.constant 112 : index
    %c0_37 = arith.constant 0 : index
    %95 = vector.load %arg5[%c112, %c0_37] : memref<584x128xf32, #tpu.memory_space<vmem>>, vector<32x64xf32>
    %cst_38 = arith.constant dense<0.000000e+00> : vector<48x64xf32>
    %96 = tpu.matmul %94, %95, %cst_38 {dimension_numbers = #tpu.dot_dimension_numbers<[1], [0], [0], [1], [0, 0, 1, 1], [], []>} : vector<48x32xf32>, vector<32x64xf32>, vector<48x64xf32> -> vector<48x64xf32>
    %c3 = arith.constant 3 : index
    %c0_39 = arith.constant 0 : index
    %97 = vector.load %arg6[%c3, %c0_39] : memref<24x128xf32, #tpu.memory_space<vmem>>, vector<1x64xf32>
    %98 = vector.extract_strided_slice %96 {offsets = [0, 0], sizes = [48, 32], strides = [1, 1]} : vector<48x64xf32> to vector<48x32xf32>
    %99 = vector.extract_strided_slice %97 {offsets = [0, 0], sizes = [1, 32], strides = [1, 1]} : vector<1x64xf32> to vector<1x32xf32>
    %100 = vector.broadcast %99 : vector<1x32xf32> to vector<48x32xf32>
    %101 = arith.addf %98, %100 : vector<48x32xf32>
    %102 = vector.extract_strided_slice %96 {offsets = [0, 32], sizes = [48, 32], strides = [1, 1]} : vector<48x64xf32> to vector<48x32xf32>
    %103 = vector.extract_strided_slice %97 {offsets = [0, 32], sizes = [1, 32], strides = [1, 1]} : vector<1x64xf32> to vector<1x32xf32>
    %104 = vector.broadcast %103 : vector<1x32xf32> to vector<48x32xf32>
    %105 = arith.addf %102, %104 : vector<48x32xf32>
    %106 = vector.shape_cast %32 : vector<48x1xi1> to vector<48x1xi1>
    %107 = vector.broadcast %106 : vector<48x1xi1> to vector<48x32xi1>
    %108 = arith.select %107, %101, %105 : vector<48x32xi1>, vector<48x32xf32>
    %109 = arith.addf %65, %108 : vector<48x32xf32>
    %c4 = arith.constant 4 : index
    %c0_40 = arith.constant 0 : index
    %110 = vector.load %arg6[%c4, %c0_40] : memref<24x128xf32, #tpu.memory_space<vmem>>, vector<1x64xf32>
    %c5 = arith.constant 5 : index
    %c0_41 = arith.constant 0 : index
    %111 = vector.load %arg6[%c5, %c0_41] : memref<24x128xf32, #tpu.memory_space<vmem>>, vector<1x64xf32>
    %112 = vector.extract_strided_slice %110 {offsets = [0, 0], sizes = [1, 32], strides = [1, 1]} : vector<1x64xf32> to vector<1x32xf32>
    %113 = vector.extract_strided_slice %110 {offsets = [0, 32], sizes = [1, 32], strides = [1, 1]} : vector<1x64xf32> to vector<1x32xf32>
    %114 = vector.shape_cast %32 : vector<48x1xi1> to vector<48x1xi1>
    %115 = vector.broadcast %114 : vector<48x1xi1> to vector<48x32xi1>
    %116 = vector.shape_cast %112 : vector<1x32xf32> to vector<1x32xf32>
    %117 = vector.broadcast %116 : vector<1x32xf32> to vector<48x32xf32>
    %118 = vector.shape_cast %113 : vector<1x32xf32> to vector<1x32xf32>
    %119 = vector.broadcast %118 : vector<1x32xf32> to vector<48x32xf32>
    %120 = arith.select %115, %117, %119 : vector<48x32xi1>, vector<48x32xf32>
    %121 = vector.extract_strided_slice %111 {offsets = [0, 0], sizes = [1, 32], strides = [1, 1]} : vector<1x64xf32> to vector<1x32xf32>
    %122 = vector.extract_strided_slice %111 {offsets = [0, 32], sizes = [1, 32], strides = [1, 1]} : vector<1x64xf32> to vector<1x32xf32>
    %123 = vector.shape_cast %32 : vector<48x1xi1> to vector<48x1xi1>
    %124 = vector.broadcast %123 : vector<48x1xi1> to vector<48x32xi1>
    %125 = vector.shape_cast %121 : vector<1x32xf32> to vector<1x32xf32>
    %126 = vector.broadcast %125 : vector<1x32xf32> to vector<48x32xf32>
    %127 = vector.shape_cast %122 : vector<1x32xf32> to vector<1x32xf32>
    %128 = vector.broadcast %127 : vector<1x32xf32> to vector<48x32xf32>
    %129 = arith.select %124, %126, %128 : vector<48x32xi1>, vector<48x32xf32>
    %cst_42 = arith.constant dense<0.000000e+00> : vector<48xf32>
    %130 = vector.multi_reduction <add>, %109, %cst_42 [1] : vector<48x32xf32> to vector<48xf32>
    %131 = vector.shape_cast %130 : vector<48xf32> to vector<48x1xf32>
    %cst_43 = arith.constant 3.200000e+01 : f32
    %132 = vector.broadcast %cst_43 : f32 to vector<48x1xf32>
    %133 = arith.divf %131, %132 : vector<48x1xf32>
    %134 = vector.broadcast %133 : vector<48x1xf32> to vector<48x32xf32>
    %135 = arith.subf %109, %134 : vector<48x32xf32>
    %136 = arith.mulf %135, %135 : vector<48x32xf32>
    %cst_44 = arith.constant dense<0.000000e+00> : vector<48xf32>
    %137 = vector.multi_reduction <add>, %136, %cst_44 [1] : vector<48x32xf32> to vector<48xf32>
    %138 = vector.shape_cast %137 : vector<48xf32> to vector<48x1xf32>
    %cst_45 = arith.constant 3.200000e+01 : f32
    %139 = vector.broadcast %cst_45 : f32 to vector<48x1xf32>
    %140 = arith.divf %138, %139 : vector<48x1xf32>
    %141 = vector.broadcast %133 : vector<48x1xf32> to vector<48x32xf32>
    %142 = arith.subf %109, %141 : vector<48x32xf32>
    %cst_46 = arith.constant 9.99999974E-6 : f32
    %143 = vector.broadcast %cst_46 : f32 to vector<48x1xf32>
    %144 = arith.addf %140, %143 : vector<48x1xf32>
    %145 = math.rsqrt %144 : vector<48x1xf32>
    %146 = vector.broadcast %145 : vector<48x1xf32> to vector<48x32xf32>
    %147 = arith.mulf %142, %146 : vector<48x32xf32>
    %148 = arith.mulf %147, %120 : vector<48x32xf32>
    %149 = arith.addf %148, %129 : vector<48x32xf32>
    %c144 = arith.constant 144 : index
    %c0_47 = arith.constant 0 : index
    %150 = vector.load %arg5[%c144, %c0_47] : memref<584x128xf32, #tpu.memory_space<vmem>>, vector<32x128xf32>
    %cst_48 = arith.constant dense<0.000000e+00> : vector<48x128xf32>
    %151 = tpu.matmul %149, %150, %cst_48 {dimension_numbers = #tpu.dot_dimension_numbers<[1], [0], [0], [1], [0, 0, 1, 1], [], []>} : vector<48x32xf32>, vector<32x128xf32>, vector<48x128xf32> -> vector<48x128xf32>
    %c6 = arith.constant 6 : index
    %c0_49 = arith.constant 0 : index
    %152 = vector.load %arg6[%c6, %c0_49] : memref<24x128xf32, #tpu.memory_space<vmem>>, vector<1x128xf32>
    %153 = vector.broadcast %152 : vector<1x128xf32> to vector<48x128xf32>
    %154 = arith.addf %151, %153 : vector<48x128xf32>
    %cst_50 = arith.constant 0.000000e+00 : f32
    %155 = vector.broadcast %cst_50 : f32 to vector<48x128xf32>
    %156 = arith.maximumf %154, %155 : vector<48x128xf32>
    %c176 = arith.constant 176 : index
    %c0_51 = arith.constant 0 : index
    %157 = vector.load %arg5[%c176, %c0_51] : memref<584x128xf32, #tpu.memory_space<vmem>>, vector<128x64xf32>
    %cst_52 = arith.constant dense<0.000000e+00> : vector<48x64xf32>
    %158 = tpu.matmul %156, %157, %cst_52 {dimension_numbers = #tpu.dot_dimension_numbers<[1], [0], [0], [1], [0, 0, 1, 1], [], []>} : vector<48x128xf32>, vector<128x64xf32>, vector<48x64xf32> -> vector<48x64xf32>
    %c7 = arith.constant 7 : index
    %c0_53 = arith.constant 0 : index
    %159 = vector.load %arg6[%c7, %c0_53] : memref<24x128xf32, #tpu.memory_space<vmem>>, vector<1x64xf32>
    %160 = vector.extract_strided_slice %158 {offsets = [0, 0], sizes = [48, 32], strides = [1, 1]} : vector<48x64xf32> to vector<48x32xf32>
    %161 = vector.extract_strided_slice %159 {offsets = [0, 0], sizes = [1, 32], strides = [1, 1]} : vector<1x64xf32> to vector<1x32xf32>
    %162 = vector.broadcast %161 : vector<1x32xf32> to vector<48x32xf32>
    %163 = arith.addf %160, %162 : vector<48x32xf32>
    %164 = vector.extract_strided_slice %158 {offsets = [0, 32], sizes = [48, 32], strides = [1, 1]} : vector<48x64xf32> to vector<48x32xf32>
    %165 = vector.extract_strided_slice %159 {offsets = [0, 32], sizes = [1, 32], strides = [1, 1]} : vector<1x64xf32> to vector<1x32xf32>
    %166 = vector.broadcast %165 : vector<1x32xf32> to vector<48x32xf32>
    %167 = arith.addf %164, %166 : vector<48x32xf32>
    %168 = vector.shape_cast %32 : vector<48x1xi1> to vector<48x1xi1>
    %169 = vector.broadcast %168 : vector<48x1xi1> to vector<48x32xi1>
    %170 = arith.select %169, %163, %167 : vector<48x32xi1>, vector<48x32xf32>
    %c8_54 = arith.constant 8 : index
    %c0_55 = arith.constant 0 : index
    %171 = vector.load %arg6[%c8_54, %c0_55] : memref<24x128xf32, #tpu.memory_space<vmem>>, vector<1x64xf32>
    %c9 = arith.constant 9 : index
    %c0_56 = arith.constant 0 : index
    %172 = vector.load %arg6[%c9, %c0_56] : memref<24x128xf32, #tpu.memory_space<vmem>>, vector<1x64xf32>
    %173 = arith.addf %149, %170 : vector<48x32xf32>
    %174 = vector.extract_strided_slice %171 {offsets = [0, 0], sizes = [1, 32], strides = [1, 1]} : vector<1x64xf32> to vector<1x32xf32>
    %175 = vector.extract_strided_slice %171 {offsets = [0, 32], sizes = [1, 32], strides = [1, 1]} : vector<1x64xf32> to vector<1x32xf32>
    %176 = vector.shape_cast %32 : vector<48x1xi1> to vector<48x1xi1>
    %177 = vector.broadcast %176 : vector<48x1xi1> to vector<48x32xi1>
    %178 = vector.shape_cast %174 : vector<1x32xf32> to vector<1x32xf32>
    %179 = vector.broadcast %178 : vector<1x32xf32> to vector<48x32xf32>
    %180 = vector.shape_cast %175 : vector<1x32xf32> to vector<1x32xf32>
    %181 = vector.broadcast %180 : vector<1x32xf32> to vector<48x32xf32>
    %182 = arith.select %177, %179, %181 : vector<48x32xi1>, vector<48x32xf32>
    %183 = vector.extract_strided_slice %172 {offsets = [0, 0], sizes = [1, 32], strides = [1, 1]} : vector<1x64xf32> to vector<1x32xf32>
    %184 = vector.extract_strided_slice %172 {offsets = [0, 32], sizes = [1, 32], strides = [1, 1]} : vector<1x64xf32> to vector<1x32xf32>
    %185 = vector.shape_cast %32 : vector<48x1xi1> to vector<48x1xi1>
    %186 = vector.broadcast %185 : vector<48x1xi1> to vector<48x32xi1>
    %187 = vector.shape_cast %183 : vector<1x32xf32> to vector<1x32xf32>
    %188 = vector.broadcast %187 : vector<1x32xf32> to vector<48x32xf32>
    %189 = vector.shape_cast %184 : vector<1x32xf32> to vector<1x32xf32>
    %190 = vector.broadcast %189 : vector<1x32xf32> to vector<48x32xf32>
    %191 = arith.select %186, %188, %190 : vector<48x32xi1>, vector<48x32xf32>
    %cst_57 = arith.constant dense<0.000000e+00> : vector<48xf32>
    %192 = vector.multi_reduction <add>, %173, %cst_57 [1] : vector<48x32xf32> to vector<48xf32>
    %193 = vector.shape_cast %192 : vector<48xf32> to vector<48x1xf32>
    %cst_58 = arith.constant 3.200000e+01 : f32
    %194 = vector.broadcast %cst_58 : f32 to vector<48x1xf32>
    %195 = arith.divf %193, %194 : vector<48x1xf32>
    %196 = vector.broadcast %195 : vector<48x1xf32> to vector<48x32xf32>
    %197 = arith.subf %173, %196 : vector<48x32xf32>
    %198 = arith.mulf %197, %197 : vector<48x32xf32>
    %cst_59 = arith.constant dense<0.000000e+00> : vector<48xf32>
    %199 = vector.multi_reduction <add>, %198, %cst_59 [1] : vector<48x32xf32> to vector<48xf32>
    %200 = vector.shape_cast %199 : vector<48xf32> to vector<48x1xf32>
    %cst_60 = arith.constant 3.200000e+01 : f32
    %201 = vector.broadcast %cst_60 : f32 to vector<48x1xf32>
    %202 = arith.divf %200, %201 : vector<48x1xf32>
    %203 = vector.broadcast %195 : vector<48x1xf32> to vector<48x32xf32>
    %204 = arith.subf %173, %203 : vector<48x32xf32>
    %cst_61 = arith.constant 9.99999974E-6 : f32
    %205 = vector.broadcast %cst_61 : f32 to vector<48x1xf32>
    %206 = arith.addf %202, %205 : vector<48x1xf32>
    %207 = math.rsqrt %206 : vector<48x1xf32>
    %208 = vector.broadcast %207 : vector<48x1xf32> to vector<48x32xf32>
    %209 = arith.mulf %204, %208 : vector<48x32xf32>
    %210 = arith.mulf %209, %182 : vector<48x32xf32>
    %211 = arith.addf %210, %191 : vector<48x32xf32>
    %c304 = arith.constant 304 : index
    %c0_62 = arith.constant 0 : index
    %212 = vector.load %arg5[%c304, %c0_62] : memref<584x128xf32, #tpu.memory_space<vmem>>, vector<32x128xf32>
    %cst_63 = arith.constant dense<0.000000e+00> : vector<48x128xf32>
    %213 = tpu.matmul %211, %212, %cst_63 {dimension_numbers = #tpu.dot_dimension_numbers<[1], [0], [0], [1], [0, 0, 1, 1], [], []>} : vector<48x32xf32>, vector<32x128xf32>, vector<48x128xf32> -> vector<48x128xf32>
    %214 = vector.extract_strided_slice %213 {offsets = [0, 0], sizes = [16, 32], strides = [1, 1]} : vector<48x128xf32> to vector<16x32xf32>
    %215 = vector.extract_strided_slice %213 {offsets = [0, 32], sizes = [16, 64], strides = [1, 1]} : vector<48x128xf32> to vector<16x64xf32>
    %216 = vector.extract_strided_slice %213 {offsets = [16, 96], sizes = [32, 32], strides = [1, 1]} : vector<48x128xf32> to vector<32x32xf32>
    %cst_64 = arith.constant dense<0.000000e+00> : vector<32x32xf32>
    %217 = tpu.matmul %16, %214, %cst_64 {dimension_numbers = #tpu.dot_dimension_numbers<[1], [0], [0], [1], [0, 0, 1, 1], [], []>} : vector<32x16xf32>, vector<16x32xf32>, vector<32x32xf32> -> vector<32x32xf32>
    %cst_65 = arith.constant dense<0.000000e+00> : vector<32x64xf32>
    %218 = tpu.matmul %12, %215, %cst_65 {dimension_numbers = #tpu.dot_dimension_numbers<[1], [0], [0], [1], [0, 0, 1, 1], [], []>} : vector<32x16xf32>, vector<16x64xf32>, vector<32x64xf32> -> vector<32x64xf32>
    %219 = vector.extract_strided_slice %218 {offsets = [0, 0], sizes = [32, 32], strides = [1, 1]} : vector<32x64xf32> to vector<32x32xf32>
    %220 = vector.extract_strided_slice %218 {offsets = [0, 32], sizes = [32, 32], strides = [1, 1]} : vector<32x64xf32> to vector<32x32xf32>
    %221 = arith.mulf %219, %217 : vector<32x32xf32>
    %cst_66 = arith.constant 0.353553385 : f32
    %222 = vector.broadcast %cst_66 : f32 to vector<32x32xf32>
    %223 = arith.mulf %221, %222 : vector<32x32xf32>
    %224 = arith.mulf %223, %216 : vector<32x32xf32>
    %cst_67 = arith.constant dense<0.000000e+00> : vector<32x32xf32>
    %225 = tpu.matmul %224, %23, %cst_67 {dimension_numbers = #tpu.dot_dimension_numbers<[1], [0], [0], [1], [0, 0, 1, 1], [], []>} : vector<32x32xf32>, vector<32x32xf32>, vector<32x32xf32> -> vector<32x32xf32>
    %cst_68 = arith.constant -5.000000e+00 : f32
    %cst_69 = arith.constant 5.000000e+00 : f32
    %226 = vector.broadcast %cst_68 : f32 to vector<32x32xf32>
    %227 = arith.maximumf %226, %225 : vector<32x32xf32>
    %228 = vector.broadcast %cst_69 : f32 to vector<32x32xf32>
    %229 = arith.minimumf %228, %227 : vector<32x32xf32>
    %230 = math.exp %229 : vector<32x32xf32>
    %231 = arith.mulf %230, %220 : vector<32x32xf32>
    %232 = tpu.concatenate %231, %230 in 1 : vector<32x32xf32>, vector<32x32xf32> -> vector<32x64xf32>
    %cst_70 = arith.constant dense<0.000000e+00> : vector<16x64xf32>
    %233 = tpu.matmul %16, %232, %cst_70 {dimension_numbers = #tpu.dot_dimension_numbers<[0], [0], [1], [1], [0, 1, 1, 1], [], []>} : vector<32x16xf32>, vector<32x64xf32>, vector<16x64xf32> -> vector<16x64xf32>
    %234 = vector.extract_strided_slice %233 {offsets = [0, 0], sizes = [16, 32], strides = [1, 1]} : vector<16x64xf32> to vector<16x32xf32>
    %235 = vector.extract_strided_slice %233 {offsets = [0, 32], sizes = [16, 32], strides = [1, 1]} : vector<16x64xf32> to vector<16x32xf32>
    %cst_71 = arith.constant 9.99999997E-7 : f32
    %236 = vector.broadcast %cst_71 : f32 to vector<16x32xf32>
    %237 = arith.addf %235, %236 : vector<16x32xf32>
    %238 = tpu.reciprocal %237 {approx = true} : vector<16x32xf32> -> vector<16x32xf32>
    %239 = arith.mulf %234, %238 : vector<16x32xf32>
    %240 = tpu.concatenate %239, %224 in 0 : vector<16x32xf32>, vector<32x32xf32> -> vector<48x32xf32>
    %c336 = arith.constant 336 : index
    %c0_72 = arith.constant 0 : index
    %241 = vector.load %arg5[%c336, %c0_72] : memref<584x128xf32, #tpu.memory_space<vmem>>, vector<32x64xf32>
    %cst_73 = arith.constant dense<0.000000e+00> : vector<48x64xf32>
    %242 = tpu.matmul %240, %241, %cst_73 {dimension_numbers = #tpu.dot_dimension_numbers<[1], [0], [0], [1], [0, 0, 1, 1], [], []>} : vector<48x32xf32>, vector<32x64xf32>, vector<48x64xf32> -> vector<48x64xf32>
    %c10 = arith.constant 10 : index
    %c0_74 = arith.constant 0 : index
    %243 = vector.load %arg6[%c10, %c0_74] : memref<24x128xf32, #tpu.memory_space<vmem>>, vector<1x64xf32>
    %244 = vector.extract_strided_slice %242 {offsets = [0, 0], sizes = [48, 32], strides = [1, 1]} : vector<48x64xf32> to vector<48x32xf32>
    %245 = vector.extract_strided_slice %243 {offsets = [0, 0], sizes = [1, 32], strides = [1, 1]} : vector<1x64xf32> to vector<1x32xf32>
    %246 = vector.broadcast %245 : vector<1x32xf32> to vector<48x32xf32>
    %247 = arith.addf %244, %246 : vector<48x32xf32>
    %248 = vector.extract_strided_slice %242 {offsets = [0, 32], sizes = [48, 32], strides = [1, 1]} : vector<48x64xf32> to vector<48x32xf32>
    %249 = vector.extract_strided_slice %243 {offsets = [0, 32], sizes = [1, 32], strides = [1, 1]} : vector<1x64xf32> to vector<1x32xf32>
    %250 = vector.broadcast %249 : vector<1x32xf32> to vector<48x32xf32>
    %251 = arith.addf %248, %250 : vector<48x32xf32>
    %252 = vector.shape_cast %32 : vector<48x1xi1> to vector<48x1xi1>
    %253 = vector.broadcast %252 : vector<48x1xi1> to vector<48x32xi1>
    %254 = arith.select %253, %247, %251 : vector<48x32xi1>, vector<48x32xf32>
    %255 = arith.addf %211, %254 : vector<48x32xf32>
    %c11 = arith.constant 11 : index
    %c0_75 = arith.constant 0 : index
    %256 = vector.load %arg6[%c11, %c0_75] : memref<24x128xf32, #tpu.memory_space<vmem>>, vector<1x64xf32>
    %c12 = arith.constant 12 : index
    %c0_76 = arith.constant 0 : index
    %257 = vector.load %arg6[%c12, %c0_76] : memref<24x128xf32, #tpu.memory_space<vmem>>, vector<1x64xf32>
    %258 = vector.extract_strided_slice %256 {offsets = [0, 0], sizes = [1, 32], strides = [1, 1]} : vector<1x64xf32> to vector<1x32xf32>
    %259 = vector.extract_strided_slice %256 {offsets = [0, 32], sizes = [1, 32], strides = [1, 1]} : vector<1x64xf32> to vector<1x32xf32>
    %260 = vector.shape_cast %32 : vector<48x1xi1> to vector<48x1xi1>
    %261 = vector.broadcast %260 : vector<48x1xi1> to vector<48x32xi1>
    %262 = vector.shape_cast %258 : vector<1x32xf32> to vector<1x32xf32>
    %263 = vector.broadcast %262 : vector<1x32xf32> to vector<48x32xf32>
    %264 = vector.shape_cast %259 : vector<1x32xf32> to vector<1x32xf32>
    %265 = vector.broadcast %264 : vector<1x32xf32> to vector<48x32xf32>
    %266 = arith.select %261, %263, %265 : vector<48x32xi1>, vector<48x32xf32>
    %267 = vector.extract_strided_slice %257 {offsets = [0, 0], sizes = [1, 32], strides = [1, 1]} : vector<1x64xf32> to vector<1x32xf32>
    %268 = vector.extract_strided_slice %257 {offsets = [0, 32], sizes = [1, 32], strides = [1, 1]} : vector<1x64xf32> to vector<1x32xf32>
    %269 = vector.shape_cast %32 : vector<48x1xi1> to vector<48x1xi1>
    %270 = vector.broadcast %269 : vector<48x1xi1> to vector<48x32xi1>
    %271 = vector.shape_cast %267 : vector<1x32xf32> to vector<1x32xf32>
    %272 = vector.broadcast %271 : vector<1x32xf32> to vector<48x32xf32>
    %273 = vector.shape_cast %268 : vector<1x32xf32> to vector<1x32xf32>
    %274 = vector.broadcast %273 : vector<1x32xf32> to vector<48x32xf32>
    %275 = arith.select %270, %272, %274 : vector<48x32xi1>, vector<48x32xf32>
    %cst_77 = arith.constant dense<0.000000e+00> : vector<48xf32>
    %276 = vector.multi_reduction <add>, %255, %cst_77 [1] : vector<48x32xf32> to vector<48xf32>
    %277 = vector.shape_cast %276 : vector<48xf32> to vector<48x1xf32>
    %cst_78 = arith.constant 3.200000e+01 : f32
    %278 = vector.broadcast %cst_78 : f32 to vector<48x1xf32>
    %279 = arith.divf %277, %278 : vector<48x1xf32>
    %280 = vector.broadcast %279 : vector<48x1xf32> to vector<48x32xf32>
    %281 = arith.subf %255, %280 : vector<48x32xf32>
    %282 = arith.mulf %281, %281 : vector<48x32xf32>
    %cst_79 = arith.constant dense<0.000000e+00> : vector<48xf32>
    %283 = vector.multi_reduction <add>, %282, %cst_79 [1] : vector<48x32xf32> to vector<48xf32>
    %284 = vector.shape_cast %283 : vector<48xf32> to vector<48x1xf32>
    %cst_80 = arith.constant 3.200000e+01 : f32
    %285 = vector.broadcast %cst_80 : f32 to vector<48x1xf32>
    %286 = arith.divf %284, %285 : vector<48x1xf32>
    %287 = vector.broadcast %279 : vector<48x1xf32> to vector<48x32xf32>
    %288 = arith.subf %255, %287 : vector<48x32xf32>
    %cst_81 = arith.constant 9.99999974E-6 : f32
    %289 = vector.broadcast %cst_81 : f32 to vector<48x1xf32>
    %290 = arith.addf %286, %289 : vector<48x1xf32>
    %291 = math.rsqrt %290 : vector<48x1xf32>
    %292 = vector.broadcast %291 : vector<48x1xf32> to vector<48x32xf32>
    %293 = arith.mulf %288, %292 : vector<48x32xf32>
    %294 = arith.mulf %293, %266 : vector<48x32xf32>
    %295 = arith.addf %294, %275 : vector<48x32xf32>
    %c368 = arith.constant 368 : index
    %c0_82 = arith.constant 0 : index
    %296 = vector.load %arg5[%c368, %c0_82] : memref<584x128xf32, #tpu.memory_space<vmem>>, vector<32x128xf32>
    %cst_83 = arith.constant dense<0.000000e+00> : vector<48x128xf32>
    %297 = tpu.matmul %295, %296, %cst_83 {dimension_numbers = #tpu.dot_dimension_numbers<[1], [0], [0], [1], [0, 0, 1, 1], [], []>} : vector<48x32xf32>, vector<32x128xf32>, vector<48x128xf32> -> vector<48x128xf32>
    %c13 = arith.constant 13 : index
    %c0_84 = arith.constant 0 : index
    %298 = vector.load %arg6[%c13, %c0_84] : memref<24x128xf32, #tpu.memory_space<vmem>>, vector<1x128xf32>
    %299 = vector.broadcast %298 : vector<1x128xf32> to vector<48x128xf32>
    %300 = arith.addf %297, %299 : vector<48x128xf32>
    %cst_85 = arith.constant 0.000000e+00 : f32
    %301 = vector.broadcast %cst_85 : f32 to vector<48x128xf32>
    %302 = arith.maximumf %300, %301 : vector<48x128xf32>
    %c400 = arith.constant 400 : index
    %c0_86 = arith.constant 0 : index
    %303 = vector.load %arg5[%c400, %c0_86] : memref<584x128xf32, #tpu.memory_space<vmem>>, vector<128x64xf32>
    %cst_87 = arith.constant dense<0.000000e+00> : vector<48x64xf32>
    %304 = tpu.matmul %302, %303, %cst_87 {dimension_numbers = #tpu.dot_dimension_numbers<[1], [0], [0], [1], [0, 0, 1, 1], [], []>} : vector<48x128xf32>, vector<128x64xf32>, vector<48x64xf32> -> vector<48x64xf32>
    %c14 = arith.constant 14 : index
    %c0_88 = arith.constant 0 : index
    %305 = vector.load %arg6[%c14, %c0_88] : memref<24x128xf32, #tpu.memory_space<vmem>>, vector<1x64xf32>
    %306 = vector.extract_strided_slice %304 {offsets = [0, 0], sizes = [48, 32], strides = [1, 1]} : vector<48x64xf32> to vector<48x32xf32>
    %307 = vector.extract_strided_slice %305 {offsets = [0, 0], sizes = [1, 32], strides = [1, 1]} : vector<1x64xf32> to vector<1x32xf32>
    %308 = vector.broadcast %307 : vector<1x32xf32> to vector<48x32xf32>
    %309 = arith.addf %306, %308 : vector<48x32xf32>
    %310 = vector.extract_strided_slice %304 {offsets = [0, 32], sizes = [48, 32], strides = [1, 1]} : vector<48x64xf32> to vector<48x32xf32>
    %311 = vector.extract_strided_slice %305 {offsets = [0, 32], sizes = [1, 32], strides = [1, 1]} : vector<1x64xf32> to vector<1x32xf32>
    %312 = vector.broadcast %311 : vector<1x32xf32> to vector<48x32xf32>
    %313 = arith.addf %310, %312 : vector<48x32xf32>
    %314 = vector.shape_cast %32 : vector<48x1xi1> to vector<48x1xi1>
    %315 = vector.broadcast %314 : vector<48x1xi1> to vector<48x32xi1>
    %316 = arith.select %315, %309, %313 : vector<48x32xi1>, vector<48x32xf32>
    %c15 = arith.constant 15 : index
    %c0_89 = arith.constant 0 : index
    %317 = vector.load %arg6[%c15, %c0_89] : memref<24x128xf32, #tpu.memory_space<vmem>>, vector<1x64xf32>
    %c16 = arith.constant 16 : index
    %c0_90 = arith.constant 0 : index
    %318 = vector.load %arg6[%c16, %c0_90] : memref<24x128xf32, #tpu.memory_space<vmem>>, vector<1x64xf32>
    %319 = arith.addf %295, %316 : vector<48x32xf32>
    %320 = vector.extract_strided_slice %317 {offsets = [0, 0], sizes = [1, 32], strides = [1, 1]} : vector<1x64xf32> to vector<1x32xf32>
    %321 = vector.extract_strided_slice %317 {offsets = [0, 32], sizes = [1, 32], strides = [1, 1]} : vector<1x64xf32> to vector<1x32xf32>
    %322 = vector.shape_cast %32 : vector<48x1xi1> to vector<48x1xi1>
    %323 = vector.broadcast %322 : vector<48x1xi1> to vector<48x32xi1>
    %324 = vector.shape_cast %320 : vector<1x32xf32> to vector<1x32xf32>
    %325 = vector.broadcast %324 : vector<1x32xf32> to vector<48x32xf32>
    %326 = vector.shape_cast %321 : vector<1x32xf32> to vector<1x32xf32>
    %327 = vector.broadcast %326 : vector<1x32xf32> to vector<48x32xf32>
    %328 = arith.select %323, %325, %327 : vector<48x32xi1>, vector<48x32xf32>
    %329 = vector.extract_strided_slice %318 {offsets = [0, 0], sizes = [1, 32], strides = [1, 1]} : vector<1x64xf32> to vector<1x32xf32>
    %330 = vector.extract_strided_slice %318 {offsets = [0, 32], sizes = [1, 32], strides = [1, 1]} : vector<1x64xf32> to vector<1x32xf32>
    %331 = vector.shape_cast %32 : vector<48x1xi1> to vector<48x1xi1>
    %332 = vector.broadcast %331 : vector<48x1xi1> to vector<48x32xi1>
    %333 = vector.shape_cast %329 : vector<1x32xf32> to vector<1x32xf32>
    %334 = vector.broadcast %333 : vector<1x32xf32> to vector<48x32xf32>
    %335 = vector.shape_cast %330 : vector<1x32xf32> to vector<1x32xf32>
    %336 = vector.broadcast %335 : vector<1x32xf32> to vector<48x32xf32>
    %337 = arith.select %332, %334, %336 : vector<48x32xi1>, vector<48x32xf32>
    %cst_91 = arith.constant dense<0.000000e+00> : vector<48xf32>
    %338 = vector.multi_reduction <add>, %319, %cst_91 [1] : vector<48x32xf32> to vector<48xf32>
    %339 = vector.shape_cast %338 : vector<48xf32> to vector<48x1xf32>
    %cst_92 = arith.constant 3.200000e+01 : f32
    %340 = vector.broadcast %cst_92 : f32 to vector<48x1xf32>
    %341 = arith.divf %339, %340 : vector<48x1xf32>
    %342 = vector.broadcast %341 : vector<48x1xf32> to vector<48x32xf32>
    %343 = arith.subf %319, %342 : vector<48x32xf32>
    %344 = arith.mulf %343, %343 : vector<48x32xf32>
    %cst_93 = arith.constant dense<0.000000e+00> : vector<48xf32>
    %345 = vector.multi_reduction <add>, %344, %cst_93 [1] : vector<48x32xf32> to vector<48xf32>
    %346 = vector.shape_cast %345 : vector<48xf32> to vector<48x1xf32>
    %cst_94 = arith.constant 3.200000e+01 : f32
    %347 = vector.broadcast %cst_94 : f32 to vector<48x1xf32>
    %348 = arith.divf %346, %347 : vector<48x1xf32>
    %349 = vector.broadcast %341 : vector<48x1xf32> to vector<48x32xf32>
    %350 = arith.subf %319, %349 : vector<48x32xf32>
    %cst_95 = arith.constant 9.99999974E-6 : f32
    %351 = vector.broadcast %cst_95 : f32 to vector<48x1xf32>
    %352 = arith.addf %348, %351 : vector<48x1xf32>
    %353 = math.rsqrt %352 : vector<48x1xf32>
    %354 = vector.broadcast %353 : vector<48x1xf32> to vector<48x32xf32>
    %355 = arith.mulf %350, %354 : vector<48x32xf32>
    %356 = arith.mulf %355, %328 : vector<48x32xf32>
    %357 = arith.addf %356, %337 : vector<48x32xf32>
    %358 = vector.extract_strided_slice %357 {offsets = [0, 0], sizes = [16, 32], strides = [1, 1]} : vector<48x32xf32> to vector<16x32xf32>
    %cst_96 = arith.constant dense<0.000000e+00> : vector<32xf32>
    %359 = vector.multi_reduction <add>, %358, %cst_96 [0] : vector<16x32xf32> to vector<32xf32>
    %360 = vector.shape_cast %359 : vector<32xf32> to vector<1x32xf32>
    %cst_97 = arith.constant 1.600000e+01 : f32
    %361 = vector.broadcast %cst_97 : f32 to vector<1x32xf32>
    %362 = arith.divf %360, %361 : vector<1x32xf32>
    %c528 = arith.constant 528 : index
    %c0_98 = arith.constant 0 : index
    %363 = vector.load %arg5[%c528, %c0_98] : memref<584x128xf32, #tpu.memory_space<vmem>>, vector<32x16xf32>
    %cst_99 = arith.constant dense<0.000000e+00> : vector<1x16xf32>
    %364 = tpu.matmul %362, %363, %cst_99 {dimension_numbers = #tpu.dot_dimension_numbers<[1], [0], [0], [1], [0, 0, 1, 1], [], []>} : vector<1x32xf32>, vector<32x16xf32>, vector<1x16xf32> -> vector<1x16xf32>
    %c17 = arith.constant 17 : index
    %c0_100 = arith.constant 0 : index
    %365 = vector.load %arg6[%c17, %c0_100] : memref<24x128xf32, #tpu.memory_space<vmem>>, vector<1x16xf32>
    %366 = arith.addf %364, %365 : vector<1x16xf32>
    %cst_101 = arith.constant 0.000000e+00 : f32
    %367 = vector.broadcast %cst_101 : f32 to vector<1x16xf32>
    %368 = arith.maximumf %366, %367 : vector<1x16xf32>
    %c560 = arith.constant 560 : index
    %c0_102 = arith.constant 0 : index
    %369 = vector.load %arg5[%c560, %c0_102] : memref<584x128xf32, #tpu.memory_space<vmem>>, vector<16x8xf32>
    %cst_103 = arith.constant dense<0.000000e+00> : vector<1x8xf32>
    %370 = tpu.matmul %368, %369, %cst_103 {dimension_numbers = #tpu.dot_dimension_numbers<[1], [0], [0], [1], [0, 0, 1, 1], [], []>} : vector<1x16xf32>, vector<16x8xf32>, vector<1x8xf32> -> vector<1x8xf32>
    %c18 = arith.constant 18 : index
    %c0_104 = arith.constant 0 : index
    %371 = vector.load %arg6[%c18, %c0_104] : memref<24x128xf32, #tpu.memory_space<vmem>>, vector<1x8xf32>
    %372 = arith.addf %370, %371 : vector<1x8xf32>
    %cst_105 = arith.constant 0.000000e+00 : f32
    %373 = vector.broadcast %cst_105 : f32 to vector<1x8xf32>
    %374 = arith.maximumf %372, %373 : vector<1x8xf32>
    %c576 = arith.constant 576 : index
    %c0_106 = arith.constant 0 : index
    %375 = vector.load %arg5[%c576, %c0_106] : memref<584x128xf32, #tpu.memory_space<vmem>>, vector<8x1xf32>
    %cst_107 = arith.constant dense<0.000000e+00> : vector<1x1xf32>
    %376 = tpu.matmul %374, %375, %cst_107 {dimension_numbers = #tpu.dot_dimension_numbers<[1], [0], [0], [1], [0, 0, 1, 1], [], []>} : vector<1x8xf32>, vector<8x1xf32>, vector<1x1xf32> -> vector<1x1xf32>
    %c19 = arith.constant 19 : index
    %c0_108 = arith.constant 0 : index
    %377 = vector.load %arg6[%c19, %c0_108] : memref<24x128xf32, #tpu.memory_space<vmem>>, vector<1x1xf32>
    %378 = arith.addf %376, %377 : vector<1x1xf32>
    %c0_109 = arith.constant 0 : index
    %c0_110 = arith.constant 0 : index
    %c0_111 = arith.constant 0 : index
    %379 = vector.load %arg7[%c0_109, %c0_110, %c0_111] : memref<1x1x1xf32, #tpu.memory_space<vmem>>, vector<1x1x1xf32>
    %380 = vector.shape_cast %379 : vector<1x1x1xf32> to vector<1x1xf32>
    %381 = vector.shape_cast %378 : vector<1x1xf32> to vector<1x1x1xf32>
    tpu.vector_store %arg7[%c0_109, %c0_110, %c0_111], %381 {strides = array<i32>} : memref<1x1x1xf32, #tpu.memory_space<vmem>>, vector<1x1x1xf32>,
    return
  }
  func.func @transform_0(%arg0: i32) -> (i32, i32, i32) {
    %c0_i32 = arith.constant 0 : i32
    %c0_i32_0 = arith.constant 0 : i32
    %c0_i32_1 = arith.constant 0 : i32
    return %arg0, %c0_i32, %c0_i32_0 : i32, i32, i32
  }
  func.func @transform_1(%arg0: i32) -> (i32, i32, i32) {
    %c0_i32 = arith.constant 0 : i32
    %c0_i32_0 = arith.constant 0 : i32
    %c0_i32_1 = arith.constant 0 : i32
    return %arg0, %c0_i32, %c0_i32_0 : i32, i32, i32
  }
  func.func @transform_2(%arg0: i32) -> (i32, i32, i32) {
    %c0_i32 = arith.constant 0 : i32
    %c0_i32_0 = arith.constant 0 : i32
    %c0_i32_1 = arith.constant 0 : i32
    return %arg0, %c0_i32, %c0_i32_0 : i32, i32, i32
  }
  func.func @transform_3(%arg0: i32) -> (i32, i32, i32) {
    %c0_i32 = arith.constant 0 : i32
    %c0_i32_0 = arith.constant 0 : i32
    %c0_i32_1 = arith.constant 0 : i32
    return %arg0, %c0_i32, %c0_i32_0 : i32, i32, i32
  }
  func.func @transform_4(%arg0: i32) -> (i32, i32) {
    %c0_i32 = arith.constant 0 : i32
    %c0_i32_0 = arith.constant 0 : i32
    %c0_i32_1 = arith.constant 0 : i32
    return %c0_i32, %c0_i32_0 : i32, i32
  }
  func.func @transform_5(%arg0: i32) -> (i32, i32) {
    %c0_i32 = arith.constant 0 : i32
    %c0_i32_0 = arith.constant 0 : i32
    %c0_i32_1 = arith.constant 0 : i32
    return %c0_i32, %c0_i32_0 : i32, i32
  }
  func.func @transform_6(%arg0: i32) -> (i32, i32, i32) {
    %c0_i32 = arith.constant 0 : i32
    %c0_i32_0 = arith.constant 0 : i32
    %c0_i32_1 = arith.constant 0 : i32
    return %arg0, %c0_i32, %c0_i32_0 : i32, i32, i32
  }
}

</mosaic_0001>

<bundles_post_ra>
// kernel: graph_transformer_net_forward.1
= control target key start
LH: loop header
LB: loop body
LE: loop exit
PB: predicated region body
PF: predicated region fallthrough
CT: control target
= control target key end

     0   :  { %11 = vsyncpa [#allocation3], 0  ;;  %s4459_s21 = smov 0   ;;  %s5092_s0 = inlined_call_operand.vmem [shape: f32[2,16,8], index: 0, kind: input, shape index: {}]   ;;  %s5093_s1 = inlined_call_operand.vmem [shape: f32[2,32,1], index: 1, kind: input, shape index: {}]   ;;  %s5094_s2 = inlined_call_operand.vmem [shape: s32[2,32,1], index: 2, kind: input, shape index: {}]   ;;  %s5095_s3 = inlined_call_operand.vmem [shape: s32[2,32,1], index: 3, kind: input, shape index: {}]   ;;  %s5096_s4 = inlined_call_operand.hbm [shape: f32[584,128], index: 4, kind: input, shape index: {}]   ;;  %s5097_s5 = inlined_call_operand.vmem [shape: f32[24,128], index: 5, kind: input, shape index: {}]   ;;  %s5098_s6 = inlined_call_operand.vmem [shape: f32[2,1,1], index: 6, kind: output, shape index: {}]  }
   0x1 LB: > { %s4465_s22 = sadd.s32 4294967295, %s4413_s21   ;;  %p3601_p0 = scmp.ge.s32.totalorder %s4413_s21, 1  ;;  %s4413_s21 = sphi %s4459_s21, %s17_s21  }
   0x2   : > { %p194_p1 = scmp.lt.s32.totalorder %s4413_s21, 3  ;;  %s4415_s23 = smov [#allocation2]  }
   0x3   : > { %s206_s24 = sshll.u32 %s4415_s23, 4  ;;  %p4268_p3 = scmp.eq.s32.totalorder %s4465_s22, 0  ;;  %s207_s24 = int_to_ptr.vmem [resolvable:$true] %s206_s24 }
   0x4   : > { %p4469_p2 = pnand %p3601_p0, %p194_p1  ;;  %s4388_s26 = scalar_lea.vmem %s207_s24, 9344 }
   0x5   : > { %p4389_p7 = scmp.ne.s32.totalorder %s207_s24, %s4388_s26  ;;  %p4396_p10 = scmp.lt.s32.totalorder %s207_s24, %s207_s24 }
   0x6   : > { %p4264_p4 = pneg %p4469_p2  ;;  %p4397_p11 = scmp.lt.s32.totalorder %s4388_s26, %s4388_s26 }
   0x8   : > { %p4265_p5 = pnand %p4268_p3, %p4264_p4  ;;  %p4398_p12 = por %p4397_p11, %p4396_p10 }
   0xa   : > { %p4379_p6 = pneg %p4265_p5 }
   0xc   : > { %p4391_p8 = pnand %p4389_p7, %p4379_p6 }
   0xe   : > { %p4392_p9 = pneg %p4391_p8 }
  0x10   : > { %p4399_p13 = pnand %p4398_p12, %p4392_p9 }
  0x12   : > { %4402 = shalt.err (!%p4399_p13)
}
  0x13   : > { %s4416_s27 = smov 128   ;;  %s4417_s28 = smov 8  }
  0x14   : > { %4267 = dma.hbm_to_vmem [thread:$0]  (!%p4265_p5), %s5096_s4, 9344, %s207_s24, [#allocation3], %s4416_s27, %s4416_s27, %s4417_s28  }
  0x15   : > { %257 = sbr.rel (%p4469_p2) target bundleno = 6105 (0x17d9), region = 44 }
  0x1a   : > { %4408 = dma.done.wait (%p4268_p3), [#allocation3], 9344  }
  0x1b   : > { %4410 = vsyncadd (%p4268_p3), [#allocation3], 4294957952  ;;  %p300_p0 = scmp.lt.s32.totalorder %s4465_s22, 1  ;;  %v4418_v0 = vmov 0   ;;  %v419_v1 = vld [vmem:[#allocation2] sm:$0xff]  ;;  %vm425_vm0 = vcmask 64512   ;;  %v337_v25 = vlaneseq }
  0x1c   : > { %4288 = vset.pattern.permute.xlu1 %v4418_v0  ;;  %4287 = vset.pattern.permute.xlu0 %v4418_v0  ;;  %v551_v12 = vld [vmem:[#allocation2 + $0x28] sm:$0xff]  ;;  %v550_v15 = vld [vmem:[#allocation2 + $0x20] sm:$0xff]  ;;  %v549_v16 = vld [vmem:[#allocation2 + $0x18] sm:$0xff]  ;;  %vm557_vm1 = vcmask 326656   ;;  %vm700_vm2 = vcmask 261120   ;;  %vm915_vm4 = vcmask 130048  }
  0x1d   : > { %s5109_s22 = smov (!%p300_p0, %s4465_s22), 1  ;;  %3928 = vmatprep.subr.mxu1 %v419_v1  ;;  %v548_v18 = vld [vmem:[#allocation2 + $0x10] sm:$0xff]  ;;  %v547_v19 = vld [vmem:[#allocation2 + $0x8] sm:$0xff]  ;;  %v800_v22 = vld [vmem:[#allocation2 + $0x60] sm:$0xff]  ;;  %v4508_v26 = vand.u32 127, %v337_v25  ;;  %s4420_s27 = smov 96  }
  0x1e   : > { %s3739_s7 = sshll.u32 %s5109_s22, 5  ;;  %s3738_s8 = sshll.u32 %s5109_s22, 4  ;;  %3929 = vmatpush3.msra.mxu1 %v419_v1  ;;  %v801_v21 = vld [vmem:[#allocation2 + $0x68] sm:$0xff]  ;;  %v799_v23 = vld [vmem:[#allocation2 + $0x58] sm:$0xff]  ;;  %v798_v24 = vld [vmem:[#allocation2 + $0x50] sm:$0xff] }
  0x1f   : > { %s309_s11 = scalar_lea.vmem %s5093_s1, %s3739_s7  ;;  %s304_s14 = scalar_lea.vmem %s5092_s0, %s3738_s8  ;;  %3933 = vmatprep.subr.mxu1 %v551_v12  ;;  %3963 = vmatprep.subr.mxu0 %v801_v21  ;;  %v408_v27 = vcvt.s32.f32 %v4508_v26  ;;  %v3626_v53 = vld [vmem:[%s5097_s5] ss:$0 sm:$0xff]  ;;  %v694_v58 = vld [vmem:[#allocation2 + $0x48] sm:$0xff]  ;;  %v692_v60 = vld [vmem:[#allocation2 + $0x38] sm:$0xff] }
  0x20   : > { %v327_v2 = vld [vmem:[%s309_s11 + $0x10] sm:$0xff]  ;;  %v325_v3 = vld [vmem:[%s309_s11] sm:$0xff]  ;;  %v324_v5 = vld [vmem:[%s304_s14 + $0x8] sm:$0xff]  ;;  %s319_s17 = scalar_lea.vmem %s5095_s3, %s3739_s7  ;;  %s314_s20 = scalar_lea.vmem %s5094_s2, %s3739_s7  ;;  %3964 = vmatpush3.msra.mxu0 %v801_v21 }
  0x21   : > { %519 = vperm.xlu1 %4288, %v327_v2   ;;  %v323_v4 = vld [vmem:[%s304_s14] sm:$0xff]  ;;  %509 = vperm.xlu0 %4287, %v325_v3   ;;  %v328_v6 = vld [vmem:[%s309_s11 + $0x18] sm:$0xff]  ;;  %v326_v7 = vld [vmem:[%s309_s11 + $0x8] sm:$0xff]  ;;  %v409_v28 = vmul.f32 0.20512821, %v408_v27  ;;  %s4422_s30 = smov 32   ;;  %s322_s23 = scalar_lea.vmem %s5098_s6, %s5109_s22 }
  0x22   : > { %3930 = vmatprep.mubr.msk.f32.mxu1 %vm425_vm0, %v323_v4  ;;  %v334_v8 = vld [vmem:[%s319_s17 + $0x8] sm:$0xff]  ;;  %v333_v9 = vld [vmem:[%s319_s17] sm:$0xff]  ;;  %v336_v10 = vld [vmem:[%s319_s17 + $0x18] sm:$0xff]  ;;  %3965 = vmatprep.subr.mxu0 %v800_v22 }
  0x23   : > { %3931 = vmatmul.mubr.msk.f32.vlgmr.msra.gmra.mxu1 %vm425_vm0, %v324_v5  ;;  %v335_v11 = vld [vmem:[%s319_s17 + $0x10] sm:$0xff]  ;;  %v330_v13 = vld [vmem:[%s314_s20 + $0x8] sm:$0xff]  ;;  %v329_v14 = vld [vmem:[%s314_s20] sm:$0xff]  ;;  %3966 = vmatpush3.msra.mxu0 %v800_v22 }
  0x24   : > { %3934 = vmatpush3.msra.mxu1 %v551_v12  ;;  %v331_v17 = vld [vmem:[%s314_s20 + $0x10] sm:$0xff]  ;;  %v332_v20 = vld [vmem:[%s314_s20 + $0x18] sm:$0xff]  ;;  %3967 = vmatprep.subr.mxu0 %v799_v23  ;;  %v693_v59 = vld [vmem:[#allocation2 + $0x40] sm:$0xff] }
  0x25   : > { %524 = vperm.xlu1 %4288, %v328_v6   ;;  %514 = vperm.xlu0 %4287, %v326_v7   ;;  %v691_v61 = vld [vmem:[#allocation2 + $0x30] sm:$0xff]  ;;  %v3629_v62 = vld [vmem:[%s5097_s5 + $0x1] ss:$0 sm:$0xff] }
  0x26   : > { %3935 = vmatprep.subr.mxu1 %v550_v15  ;;  %3968 = vmatpush3.msra.mxu0 %v799_v23 }
  0x27   : > { %3936 = vmatpush3.msra.mxu1 %v550_v15  ;;  %3969 = vmatprep.subr.mxu0 %v798_v24 }
  0x28   : > { %3937 = vmatprep.subr.mxu1 %v549_v16  ;;  %3970 = vmatpush3.msra.mxu0 %v798_v24 }
  0x29   : > { %367 = vperm.xlu1 %4288, %v334_v8   ;;  %364 = vperm.xlu0 %4287, %v333_v9  }
  0x2a   : > { %3938 = vmatpush3.msra.mxu1 %v549_v16 }
  0x2b   : > { %3939 = vmatprep.subr.mxu1 %v548_v18 }
  0x2c   : > { %3940 = vmatpush3.msra.mxu1 %v548_v18 }
  0x2d   : > { %373 = vperm.xlu1 %4288, %v336_v10   ;;  %370 = vperm.xlu0 %4287, %v335_v11  }
  0x2e   : > { %3941 = vmatprep.subr.mxu1 %v547_v19 }
  0x2f   : > { %3942 = vmatpush3.msra.mxu1 %v547_v19 }
  0x30   : > { %3949 = vmatprep.subr.mxu1 %v694_v58 }
  0x31   : > { %343 = vperm.xlu1 %4288, %v330_v13   ;;  %340 = vperm.xlu0 %4287, %v329_v14  }
  0x35   : > { %346 = vperm.xlu0 %4287, %v331_v17  }
  0x39   : > { %349 = vperm.xlu0 %4287, %v332_v20  }
  0x9c   : > { %v520_v29 = vpop.permute.xlu1 %519  ;;  %v510_v31 = vpop.permute.xlu0 %509 }
  0x9d   : > { %v529_v30 = vsub.f32 %v520_v29, %v409_v28  ;;  %v527_v32 = vsub.f32 %v510_v31, %v409_v28 }
  0x9f   : > { %v533_v33 = vmul.f32 %v529_v30, %v529_v30  ;;  %v531_v34 = vmul.f32 %v527_v32, %v527_v32 }
  0xa0   : > { %v525_v35 = vpop.permute.xlu1 %524  ;;  %v515_v38 = vpop.permute.xlu0 %514 }
  0xa1   : > { %v537_v36 = vmul.f32 -4.875, %v533_v33  ;;  %v530_v37 = vsub.f32 %v525_v35, %v409_v28  ;;  %v535_v39 = vmul.f32 -4.875, %v531_v34  ;;  %v528_v40 = vsub.f32 %v515_v38, %v409_v28 }
  0xa3   : > { %v534_v41 = vmul.f32 %v530_v37, %v530_v37  ;;  %v539_v42 = vmul.f32 1.442695, %v535_v39  ;;  %v532_v43 = vmul.f32 %v528_v40, %v528_v40  ;;  %v543_v44 = vmul.f32 1.442695, %v537_v36 }
  0xa4   : > { %v365_v35 = vpop.permute.xlu0 %364 }
  0xa5   : > { %4289 = vpow2.f32 %v539_v42  ;;  %v538_v45 = vmul.f32 -4.875, %v534_v41  ;;  %v536_v46 = vmul.f32 -4.875, %v532_v43  ;;  %v368_v43 = vpop.permute.xlu1 %367  ;;  %vm375_vm3 = vcmp.eq.s32.totalorder %v365_v35, %v4508_v26 }
  0xa6   : > { %4291 = vpow2.f32 %v543_v44  ;;  %vm376_vm5 = vcmp.eq.s32.totalorder %v368_v43, %v4508_v26 }
  0xa7   : > { %v541_v47 = vmul.f32 1.442695, %v536_v46  ;;  %v545_v48 = vmul.f32 1.442695, %v538_v45 }
  0xa8   : > { %v371_v45 = vpop.permute.xlu0 %370 }
  0xa9   : > { %4293 = vpow2.f32 %v541_v47  ;;  %vm377_vm6 = vcmp.eq.s32.totalorder %v371_v45, %v4508_v26 }
  0xaa   : > { %4295 = vpow2.f32 %v545_v48 }
  0xb2   : > { %v4290_v49 = vpop.eup %4289 }
  0xb3   : > { %3943 = vmatprep.mubr.msk.f32.mxu1 %vm557_vm1, %v4290_v49  ;;  %v4292_v50 = vpop.eup %4291  ;;  %v4419_v49 = vmov 0.0  }
  0xb6   : > { %v4294_v51 = vpop.eup %4293 }
  0xb7   : > { %3944 = vmatmul.mubr.msk.f32.vlgmr.msra.gmra.mxu1 %vm557_vm1, %v4294_v51  ;;  %v4296_v52 = vpop.eup %4295 }
  0xb8   : > { %3946 = vmatprep.mubr.msk.f32.mxu1 %vm557_vm1, %v4292_v50  ;;  %3950 = vmatpush3.msra.mxu1 %v694_v58  ;;  %v4530_v50 = vsel %vm375_vm3, 1.0, %v4419_v49 }
  0xb9   : > { %3951 = vmatprep.subr.mxu1 %v693_v59 }
  0xba   : > { %3952 = vmatpush3.msra.mxu1 %v693_v59 }
  0xbb   : > { %3947 = vmatmul.mubr.msk.f32.gmra.mxu1 %vm557_vm1, %v4296_v52  ;;  %3953 = vmatprep.subr.mxu1 %v692_v60  ;;  %v374_v52 = vpop.permute.xlu1 %373  ;;  %vm4423_vm1 = vmmov 0  }
  0xbc   : > { %3954 = vmatpush3.msra.mxu1 %v692_v60  ;;  %vm378_vm7 = vcmp.eq.s32.totalorder %v374_v52, %v4508_v26 }
  0xbd   : > { %3955 = vmatprep.subr.mxu1 %v691_v61  ;;  %v4552_v58 = vsel %vm378_vm7, 1.0, %v4419_v49 }
  0xbe   : > { %3956 = vmatpush3.msra.mxu1 %v691_v61 }
  0xbf   : > { %v344_v60 = vpop.permute.xlu1 %343 }
  0xc0   : > { %vm352_vm9 = vcmp.eq.s32.totalorder %v344_v60, %v4508_v26 }
  0xe3   : > { %v3932_v54 = vpop.f32.mrf.mxu1 }
  0xe4   : > { %v4514_v55 = vadd.f32 %v3932_v54, %v3626_v53  ;;  %v4539_v54 = vsel %vm376_vm5, 1.0, %v4419_v49 }
  0xe5   : > { %v498_v56 = vpop.f32.mrf.mxu1 }
  0xe6   : > { %v4516_v57 = vadd.f32 %v3626_v53, %v498_v56  ;;  %v341_v53 = vpop.permute.xlu0 %340  ;;  %v4544_v56 = vsel %vm377_vm6, 1.0, %v4419_v49 }
  0xe7   : > { %vm351_vm8 = vcmp.eq.s32.totalorder %v341_v53, %v4508_v26 }
  0xe8   : > { %3971 = vmatprep.mubr.msk.f32.mxu0 %vm700_vm2, %v4516_v57  ;;  %v4555_v59 = vsel %vm351_vm8, 1.0, %v4419_v49 }
  0xe9   : > { %3972 = vmatmul.mubr.msk.f32.vlgmr.msra.gmra.mxu0 %vm700_vm2, %v4514_v55 }
  0xea   : > { %v347_v61 = vpop.permute.xlu0 %346 }
  0xeb   : > { %vm353_vm10 = vcmp.eq.s32.totalorder %v347_v61, %v4508_v26 }
 0x177   : > { %v3945_v63 = vpop.f32.mrf.mxu1 }
 0x178   : > { %v642_v0 = vadd.f32 %v3945_v63, %v3629_v62  ;;  %v350_v63 = vpop.permute.xlu0 %349 }
 0x179   : > { %v636_v1 = vpop.f32.mrf.mxu1  ;;  %vm354_vm11 = vcmp.eq.s32.totalorder %v350_v63, %v4508_v26 }
 0x17a   : > { %v660_v2 = vand.u32 2147483647, %v642_v0  ;;  %v637_v3 = vadd.f32 %v3629_v62, %v636_v1  ;;  %v656_v36 = vmax.f32 %v642_v0, 0.0  ;;  %v4564_v1 = vsel %vm352_vm9, 1.0, %v4419_v49 }
 0x17b   : > { %v3948_v4 = vpop.f32.mrf.mxu1 }
 0x17c   : > { %v664_v5 = vsub.f32 0.0, %v660_v2  ;;  %v659_v6 = vand.u32 2147483647, %v637_v3  ;;  %v652_v7 = vadd.f32 %v3948_v4, %v3629_v62  ;;  %v655_v32 = vmax.f32 %v637_v3, 0.0 }
 0x17d   : > { %v646_v8 = vpop.f32.mrf.mxu1  ;;  %v4567_v2 = vsel %vm353_vm10, 1.0, %v4419_v49  ;;  %v4575_v3 = vsel %vm354_vm11, 1.0, %v4419_v49 }
 0x17e   : > { %v669_v9 = vmul.f32 1.442695, %v664_v5  ;;  %v663_v10 = vsub.f32 0.0, %v659_v6  ;;  %v662_v11 = vand.u32 2147483647, %v652_v7  ;;  %v647_v12 = vadd.f32 %v3629_v62, %v646_v8 }
 0x17f   : > { %v658_v44 = vmax.f32 %v652_v7, 0.0  ;;  %v3634_v5 = vld [vmem:[%s5097_s5 + $0x2] ss:$0 sm:$0xff] }
 0x180   : > { %4297 = vpow2.f32 %v669_v9  ;;  %v667_v13 = vmul.f32 1.442695, %v663_v10  ;;  %v666_v14 = vsub.f32 0.0, %v662_v11  ;;  %v661_v15 = vand.u32 2147483647, %v647_v12 }
 0x181   : > { %v657_v41 = vmax.f32 %v647_v12, 0.0 }
 0x182   : > { %4299 = vpow2.f32 %v667_v13  ;;  %v673_v16 = vmul.f32 1.442695, %v666_v14  ;;  %v665_v17 = vsub.f32 0.0, %v661_v15  ;;  %v388_v13 = vshrl.u32 %v337_v25, 7 }
 0x184   : > { %4301 = vpow2.f32 %v673_v16  ;;  %v671_v18 = vmul.f32 1.442695, %v665_v17  ;;  %v391_v14 = vadd.s32 24, %v388_v13  ;;  %v390_v15 = vadd.s32 16, %v388_v13 }
 0x185   : > { %v389_v16 = vadd.s32 8, %v388_v13 }
 0x186   : > { %4303 = vpow2.f32 %v671_v18  ;;  %v395_v17 = vxor.u32 %v391_v14, %v4508_v26  ;;  %v394_v18 = vxor.u32 %v390_v15, %v4508_v26 }
 0x188   : > { %vm4602_vm12 = vcmp.lt.s32.totalorder %v395_v17, 8  ;;  %vm4606_vm13 = vcmp.lt.s32.totalorder %v394_v18, 8 }
 0x18d   : > { %v4298_v19 = vpop.eup %4297 }
 0x18e   : > { %v676_v20 = vadd.f32 1.0, %v4298_v19  ;;  %v393_v19 = vxor.u32 %v389_v16, %v4508_v26 }
 0x18f   : > { %v4300_v21 = vpop.eup %4299 }
 0x190   : > { %4305 = vlog2.f32 %v676_v20  ;;  %v675_v22 = vadd.f32 1.0, %v4300_v21  ;;  %vm4616_vm14 = vcmp.lt.s32.totalorder %v393_v19, 8 }
 0x191   : > { %v4302_v23 = vpop.eup %4301 }
 0x192   : > { %4307 = vlog2.f32 %v675_v22  ;;  %v678_v24 = vadd.f32 1.0, %v4302_v23  ;;  %v4421_v22 = vmov 1.0  }
 0x193   : > { %v4304_v27 = vpop.eup %4303  ;;  %4000 = vmatprep.subr.msk.mxu0 %vm4602_vm12, %v4421_v22 }
 0x194   : > { %4309 = vlog2.f32 %v678_v24  ;;  %v677_v28 = vadd.f32 1.0, %v4304_v27  ;;  %4001 = vmatpush3.msk.msra.mxu0 %vm4602_vm12, %v4421_v22  ;;  %v392_v27 = vxor.u32 %v388_v13, %v4508_v26 }
 0x195   : > { %4002 = vmatprep.subr.msk.mxu0 %vm4606_vm13, %v4421_v22 }
 0x196   : > { %4311 = vlog2.f32 %v677_v28  ;;  %4003 = vmatpush3.msk.msra.mxu0 %vm4606_vm13, %v4421_v22  ;;  %vm4633_vm15 = vcmp.lt.s32.totalorder %v392_v27, 8 }
 0x197   : > { %4004 = vmatprep.subr.msk.mxu0 %vm4616_vm14, %v4421_v22 }
 0x198   : > { %4005 = vmatpush3.msk.msra.mxu0 %vm4616_vm14, %v4421_v22 }
 0x199   : > { %4006 = vmatprep.subr.msk.mxu0 %vm4633_vm15, %v4421_v22 }
 0x19a   : > { %4007 = vmatpush3.msk.msra.mxu0 %vm4633_vm15, %v4421_v22 }
 0x19d   : > { %v4306_v29 = vpop.eup %4305 }
 0x19e   : > { %v682_v31 = vmul.f32 0.6931472, %v4306_v29 }
 0x19f   : > { %v4308_v30 = vpop.eup %4307 }
 0x1a0   : > { %v680_v33 = vmul.f32 0.6931472, %v4308_v30  ;;  %v688_v38 = vadd.f32 %v682_v31, %v656_v36 }
 0x1a1   : > { %v4310_v34 = vpop.eup %4309 }
 0x1a2   : > { %v687_v37 = vadd.f32 %v680_v33, %v655_v32  ;;  %v686_v40 = vmul.f32 0.6931472, %v4310_v34 }
 0x1a3   : > { %v4312_v39 = vpop.eup %4311 }
 0x1a4   : > { %3957 = vmatprep.mubr.msk.f32.mxu1 %vm700_vm2, %v687_v37  ;;  %v684_v42 = vmul.f32 0.6931472, %v4312_v39  ;;  %v690_v47 = vadd.f32 %v686_v40, %v658_v44 }
 0x1a5   : > { %3958 = vmatmul.mubr.msk.f32.vlgmr.msra.gmra.mxu1 %vm700_vm2, %v688_v38 }
 0x1a6   : > { %v689_v46 = vadd.f32 %v684_v42, %v657_v41 }
 0x1a8   : > { %3960 = vmatprep.mubr.msk.f32.mxu1 %vm700_vm2, %v689_v46 }
 0x1a9   : > { %v3973_v48 = vpop.f32.mrf.mxu0  ;;  %3961 = vmatmul.mubr.msk.f32.gmra.mxu1 %vm700_vm2, %v690_v47 }
 0x1aa   : > { %1017 = vrot.lane.b32.xlu1 %v3973_v48, %s4420_s27  ;;  %3984 = vmatprep.mubr.msk.f32.mxu1 %vm915_vm4, %v4530_v50 }
 0x1ab   : > { %3980 = vmatprep.subr.mxu1 %v3973_v48  ;;  %v886_v51 = vpop.f32.mrf.mxu0 }
 0x1ac   : > { %3981 = vmatpush3.msra.mxu1 %v3973_v48 }
 0x1ad   : > { %3982 = vmatprep.subr.mxu1 %v886_v51 }
 0x1ae   : > { %3983 = vmatpush3.msra.mxu1 %v886_v51  ;;  %1015 = vrot.lane.b32.xlu1 %v886_v51, %s4420_s27 }
 0x1af   : > { %3985 = vmatmul.mubr.msk.f32.vlgmr.msra.gmra.mxu1 %vm915_vm4, %v4539_v54 }
 0x1b0   : > { %3987 = vmatprep.mubr.msk.f32.mxu1 %vm915_vm4, %v4544_v56 }
 0x1b3   : > { %3988 = vmatmul.mubr.msk.f32.gmra.mxu1 %vm915_vm4, %v4552_v58 }
 0x1b4   : > { %3994 = vmatprep.mubr.msk.f32.mxu1 %vm915_vm4, %v4555_v59 }
 0x21c   : > { %v1018_v62 = vpop.permute.xlu1 %1017 }
 0x21d   : > { %3990 = vmatprep.subr.mxu1 %v1018_v62 }
 0x21e   : > { %3991 = vmatpush3.msra.mxu1 %v1018_v62 }
 0x220   : > { %v1016_v0 = vpop.permute.xlu1 %1015 }
 0x221   : > { %3992 = vmatprep.subr.mxu1 %v1016_v0 }
 0x222   : > { %3993 = vmatpush3.msra.mxu1 %v1016_v0 }
 0x223   : > { %3995 = vmatmul.mubr.msk.f32.vlgmr.msra.gmra.mxu1 %vm915_vm4, %v4564_v1 }
 0x224   : > { %3997 = vmatprep.mubr.msk.f32.mxu1 %vm915_vm4, %v4567_v2 }
 0x227   : > { %3998 = vmatmul.mubr.msk.f32.gmra.mxu1 %vm915_vm4, %v4575_v3 }
 0x265   : > { %v3959_v4 = vpop.f32.mrf.mxu1 }
 0x266   : > { %v4584_v8 = vadd.f32 %v3959_v4, %v3634_v5 }
 0x267   : > { %v779_v6 = vpop.f32.mrf.mxu1 }
 0x268   : > { %v4582_v7 = vadd.f32 %v3634_v5, %v779_v6 }
 0x269   : > { %v3962_v9 = vpop.f32.mrf.mxu1 }
 0x26a   : > { %3974 = vmatprep.mubr.msk.f32.mxu0 %vm700_vm2, %v4582_v7  ;;  %v4592_v12 = vadd.f32 %v3962_v9, %v3634_v5 }
 0x26b   : > { %3975 = vmatmul.mubr.msk.f32.gmra.mxu0 %vm700_vm2, %v4584_v8  ;;  %v789_v10 = vpop.f32.mrf.mxu1 }
 0x26c   : > { %v4590_v11 = vadd.f32 %v3634_v5, %v789_v10 }
 0x26e   : > { %3977 = vmatprep.mubr.msk.f32.mxu0 %vm700_vm2, %v4590_v11 }
 0x26f   : > { %3978 = vmatmul.mubr.msk.f32.gmra.mxu0 %vm700_vm2, %v4592_v12  ;;  %v3986_v23 = vpop.f32.mrf.mxu1 }
 0x271   : > { %v994_v24 = vpop.f32.mrf.mxu1 }
 0x273   : > { %v3989_v28 = vpop.f32.mrf.mxu1 }
 0x275   : > { %v1004_v30 = vpop.f32.mrf.mxu1 }
 0x2e3   : > { %v3996_v31 = vpop.f32.mrf.mxu1 }
 0x2e4   : > { %v1119_v39 = vmul.f32 %v3996_v31, %v3986_v23 }
 0x2e5   : > { %v1099_v33 = vpop.f32.mrf.mxu1 }
 0x2e6   : > { %v1118_v38 = vmul.f32 %v1099_v33, %v994_v24  ;;  %v1123_v42 = vmul.f32 0.35355338, %v1119_v39 }
 0x2e7   : > { %v3999_v34 = vpop.f32.mrf.mxu1 }
 0x2e8   : > { %v1122_v41 = vmul.f32 0.35355338, %v1118_v38  ;;  %v1121_v45 = vmul.f32 %v3999_v34, %v3989_v28 }
 0x2e9   : > { %v1109_v37 = vpop.f32.mrf.mxu1 }
 0x2ea   : > { %v1120_v43 = vmul.f32 %v1109_v37, %v1004_v30  ;;  %v1125_v52 = vmul.f32 0.35355338, %v1121_v45 }
 0x2ec   : > { %v1124_v48 = vmul.f32 0.35355338, %v1120_v43 }
 0x32b   : > { %v3976_v32 = vpop.f32.mrf.mxu0 }
 0x32c   : > { %1132 = vrot.lane.b32.xlu1 %v3976_v32, %s4422_s30 }
 0x32d   : > { %v896_v26 = vpop.f32.mrf.mxu0 }
 0x32e   : > { %1130 = vrot.lane.b32.xlu0 %v896_v26, %s4422_s30 }
 0x32f   : > { %v3979_v35 = vpop.f32.mrf.mxu0 }
 0x330   : > { %1136 = vrot.lane.b32.xlu1 %v3979_v35, %s4422_s30 }
 0x331   : > { %v906_v36 = vpop.f32.mrf.mxu0 }
 0x332   : > { %1134 = vrot.lane.b32.xlu0 %v906_v36, %s4422_s30 }
 0x334   : > { %1267 = vrot.lane.b32.xlu1 %v1109_v37, %s4420_s27 }
 0x336   : > { %1269 = vrot.lane.b32.xlu0 %v3999_v34, %s4420_s27 }
 0x338   : > { %1265 = vrot.lane.b32.xlu1 %v3996_v31, %s4420_s27 }
 0x33c   : > { %1263 = vrot.lane.b32.xlu1 %v1099_v33, %s4420_s27 }
 0x39e   : > { %v1133_v40 = vpop.permute.xlu1 %1132 }
 0x39f   : > { %v4653_v47 = vmul.f32 %v1133_v40, %v1123_v42 }
 0x3a0   : > { %v1131_v44 = vpop.permute.xlu0 %1130 }
 0x3a1   : > { %v4651_v46 = vmul.f32 %v1131_v44, %v1122_v41  ;;  %v1429_v44 = vld [vmem:[#allocation2 + $0x88] sm:$0xff] }
 0x3a2   : > { %v1137_v51 = vpop.permute.xlu1 %1136  ;;  %4025 = vmatprep.subr.mxu0 %v1429_v44 }
 0x3a3   : > { %4008 = vmatprep.mubr.msk.f32.mxu0 %vm700_vm2, %v4651_v46  ;;  %v4661_v61 = vmul.f32 %v1137_v51, %v1125_v52 }
 0x3a4   : > { %4009 = vmatmul.mubr.msk.f32.vlgmr.msra.gmra.mxu0 %vm700_vm2, %v4653_v47  ;;  %v1135_v53 = vpop.permute.xlu0 %1134 }
 0x3a5   : > { %v4659_v60 = vmul.f32 %v1135_v53, %v1124_v48  ;;  %4026 = vmatpush3.msra.mxu0 %v1429_v44  ;;  %v1428_v53 = vld [vmem:[#allocation2 + $0x80] sm:$0xff] }
 0x3a6   : > { %v1268_v24 = vpop.permute.xlu1 %1267  ;;  %4027 = vmatprep.subr.mxu0 %v1428_v53 }
 0x3a7   : > { %4011 = vmatprep.mubr.msk.f32.mxu0 %vm700_vm2, %v4659_v60  ;;  %4028 = vmatpush3.msra.mxu0 %v1428_v53  ;;  %v1712_v53 = vld [vmem:[#allocation2 + $0x98] sm:$0xff] }
 0x3a8   : > { %4012 = vmatmul.mubr.msk.f32.gmra.mxu0 %vm700_vm2, %v4661_v61  ;;  %v1270_v27 = vpop.permute.xlu0 %1269 }
 0x3aa   : > { %v1266_v30 = vpop.permute.xlu1 %1265 }
 0x3ae   : > { %v1264_v26 = vpop.permute.xlu1 %1263 }
 0x464   : > { %v4010_v62 = vpop.f32.mrf.mxu0 }
 0x465   : > { %v3662_v63 = vclamps-f32 %v4010_v62, 5.0  ;;  %v1427_v62 = vld [vmem:[#allocation2 + $0x78] sm:$0xff] }
 0x466   : > { %v1224_v0 = vpop.f32.mrf.mxu0  ;;  %4029 = vmatprep.subr.mxu0 %v1427_v62 }
 0x467   : > { %v1253_v4 = vmul.f32 1.442695, %v3662_v63  ;;  %v3661_v5 = vclamps-f32 %v1224_v0, 5.0  ;;  %4030 = vmatpush3.msra.mxu0 %v1427_v62  ;;  %v1426_v63 = vld [vmem:[#allocation2 + $0x70] sm:$0xff] }
 0x468   : > { %v4013_v9 = vpop.f32.mrf.mxu0  ;;  %4031 = vmatprep.subr.mxu0 %v1426_v63  ;;  %v1711_v62 = vld [vmem:[#allocation2 + $0x90] sm:$0xff] }
 0x469   : > { %4313 = vpow2.f32 %v1253_v4  ;;  %v1251_v6 = vmul.f32 1.442695, %v3661_v5  ;;  %v3664_v10 = vclamps-f32 %v4013_v9, 5.0  ;;  %4032 = vmatpush3.msra.mxu0 %v1426_v63 }
 0x46a   : > { %v1234_v13 = vpop.f32.mrf.mxu0 }
 0x46b   : > { %4315 = vpow2.f32 %v1251_v6  ;;  %v1257_v14 = vmul.f32 1.442695, %v3664_v10  ;;  %v3663_v15 = vclamps-f32 %v1234_v13, 5.0  ;;  %v3673_v13 = vld [vmem:[%s5097_s5 + $0x3] ss:$0 sm:$0xff] }
 0x46d   : > { %4317 = vpow2.f32 %v1257_v14  ;;  %v1255_v16 = vmul.f32 1.442695, %v3663_v15 }
 0x46f   : > { %4319 = vpow2.f32 %v1255_v16 }
 0x476   : > { %v4314_v17 = vpop.eup %4313 }
 0x477   : > { %1285 = vrot.lane.b32.xlu0 %v4314_v17, %s4422_s30  ;;  %v1276_v37 = vmul.f32 %v4314_v17, %v1266_v30 }
 0x478   : > { %v4316_v18 = vpop.eup %4315 }
 0x479   : > { %1283 = vrot.lane.b32.xlu1 %v4316_v18, %s4422_s30  ;;  %v1275_v40 = vmul.f32 %v4316_v18, %v1264_v26 }
 0x47a   : > { %v4318_v19 = vpop.eup %4317 }
 0x47b   : > { %1289 = vrot.lane.b32.xlu0 %v4318_v19, %s4422_s30  ;;  %v1278_v31 = vmul.f32 %v4318_v19, %v1270_v27 }
 0x47c   : > { %v4320_v23 = vpop.eup %4319 }
 0x47d   : > { %v1277_v34 = vmul.f32 %v4320_v23, %v1268_v24 }
 0x47f   : > { %1287 = vrot.lane.b32.xlu0 %v4320_v23, %s4422_s30 }
 0x49d   : > { %1299 = vxpose.xlu0.b32.start [1/4] (short) (narrow) %v4530_v50, 16 }
 0x4a1   : > { %1300 = vxpose.xlu0.b32.cont [2/4] (short) (narrow) %v4539_v54, 16 }
 0x4a5   : > { %1301 = vxpose.xlu0.b32.cont [3/4] (short) (narrow) %v4544_v56, 16 }
 0x4a9   : > { %1302 = vxpose.xlu0.b32.end [4/4] (short) (narrow) %v4552_v58, 16 }
 0x4e9   : > { %v1286_v28 = vpop.permute.xlu0 %1285 }
 0x4ea   : > { %v1296_v39 = vsel %vm700_vm2, %v1276_v37, %v1286_v28 }
 0x4eb   : > { %v1284_v38 = vpop.permute.xlu1 %1283 }
 0x4ec   : > { %v1295_v41 = vsel %vm700_vm2, %v1275_v40, %v1284_v38 }
 0x4ed   : > { %v1290_v32 = vpop.permute.xlu0 %1289 }
 0x4ee   : > { %v1298_v33 = vsel %vm700_vm2, %v1278_v31, %v1290_v32 }
 0x4ef   : > { %4014 = vmatprep.subr.mxu1 %v1298_v33 }
 0x4f0   : > { %4015 = vmatpush3.msra.mxu1 %v1298_v33 }
 0x4f1   : > { %v1288_v35 = vpop.permute.xlu0 %1287 }
 0x4f2   : > { %v1297_v36 = vsel %vm700_vm2, %v1277_v34, %v1288_v35 }
 0x4f3   : > { %4016 = vmatprep.subr.mxu1 %v1297_v36 }
 0x4f4   : > { %4017 = vmatpush3.msra.mxu1 %v1297_v36 }
 0x4f5   : > { %4018 = vmatprep.subr.mxu1 %v1296_v39 }
 0x4f6   : > { %4019 = vmatpush3.msra.mxu1 %v1296_v39 }
 0x4f7   : > { %4020 = vmatprep.subr.mxu1 %v1295_v41 }
 0x4f8   : > { %4021 = vmatpush3.msra.mxu1 %v1295_v41 }
 0x519   : > { %v4679_v42 = vpop.trf.xlu0 }
 0x51a   : > { %4022 = vmatprep.mubr.msk.f32.mxu1 %vm700_vm2, %v4679_v42 }
 0x51d   : > { %v4683_v43 = vpop.trf.xlu0 }
 0x51e   : > { %4023 = vmatmul.mubr.msk.f32.vlgmr.msra.gmra.mxu1 %vm700_vm2, %v4683_v43 }
 0x5de   : > { %v4024_v45 = vpop.f32.mrf.mxu1 }
 0x5df   : > { %v1413_v52 = vadd.f32 1e-06, %v4024_v45 }
 0x5e0   : > { %v1403_v48 = vpop.f32.mrf.mxu1 }
 0x5e1   : > { %v1412_v51 = vadd.f32 1e-06, %v1403_v48 }
 0x5e3   : > { %4321 = vrcp.f32 %v1412_v51  ;;  %v1714_v51 = vld [vmem:[#allocation2 + $0xa8] sm:$0xff] }
 0x5e4   : > { %4323 = vrcp.f32 %v1413_v52  ;;  %v1713_v52 = vld [vmem:[#allocation2 + $0xa0] sm:$0xff]  ;;  %4042 = vmatprep.subr.mxu1 %v1714_v51 }
 0x5e5   : > { %4043 = vmatpush3.msra.mxu1 %v1714_v51  ;;  %v1842_v51 = vld [vmem:[#allocation2 + $0xc8] sm:$0xff] }
 0x5e6   : > { %4044 = vmatprep.subr.mxu1 %v1713_v52 }
 0x5e7   : > { %4045 = vmatpush3.msra.mxu1 %v1713_v52  ;;  %v1841_v52 = vld [vmem:[#allocation2 + $0xc0] sm:$0xff] }
 0x5e8   : > { %4046 = vmatprep.subr.mxu1 %v1712_v53 }
 0x5e9   : > { %4047 = vmatpush3.msra.mxu1 %v1712_v53  ;;  %v1840_v53 = vld [vmem:[#allocation2 + $0xb8] sm:$0xff] }
 0x5ea   : > { %4048 = vmatprep.subr.mxu1 %v1711_v62 }
 0x5eb   : > { %4049 = vmatpush3.msra.mxu1 %v1711_v62  ;;  %v1839_v62 = vld [vmem:[#allocation2 + $0xb0] sm:$0xff] }
 0x5f0   : > { %v4322_v0 = vpop.eup %4321 }
 0x5f1   : > { %1418 = vrot.lane.b32.xlu1 %v4322_v0, %s4420_s27  ;;  %v4324_v4 = vpop.eup %4323  ;;  %v3675_v0 = vld [vmem:[%s5097_s5 + $0x5] ss:$0 sm:$0xff] }
 0x5f5   : > { %1420 = vrot.lane.b32.xlu1 %v4324_v4, %s4420_s27 }
 0x663   : > { %v1419_v5 = vpop.permute.xlu1 %1418 }
 0x664   : > { %v1424_v6 = vmul.f32 %v1419_v5, %v1403_v48 }
 0x666   : > { %4033 = vmatprep.mubr.msk.f32.mxu0 %vm700_vm2, %v1424_v6 }
 0x667   : > { %v1421_v9 = vpop.permute.xlu1 %1420 }
 0x668   : > { %v1425_v10 = vmul.f32 %v4024_v45, %v1421_v9 }
 0x66a   : > { %4034 = vmatmul.mubr.msk.f32.vlgmr.msra.gmra.mxu0 %vm700_vm2, %v1425_v10 }
 0x66b   : > { %4036 = vmatprep.mubr.msk.f32.mxu0 %vm700_vm2, %v4651_v46 }
 0x66e   : > { %4037 = vmatmul.mubr.msk.f32.gmra.mxu0 %vm700_vm2, %v4653_v47 }
 0x66f   : > { %4039 = vmatprep.mubr.msk.f32.mxu0 %vm700_vm2, %v4659_v60 }
 0x672   : > { %4040 = vmatmul.mubr.msk.f32.gmra.mxu0 %vm700_vm2, %v4661_v61 }
 0x72a   : > { %v4035_v14 = vpop.f32.mrf.mxu0 }
 0x72b   : > { %v1537_v15 = vadd.f32 %v4035_v14, %v3673_v13 }
 0x72c   : > { %v1502_v16 = vpop.f32.mrf.mxu0 }
 0x72d   : > { %v1585_v17 = vadd.f32 %v1537_v15, %v4514_v55  ;;  %v1536_v61 = vadd.f32 %v3673_v13, %v1502_v16 }
 0x72e   : > { %v4038_v18 = vpop.f32.mrf.mxu0 }
 0x72f   : > { %v1539_v46 = vadd.f32 %v4038_v18, %v3673_v13  ;;  %v1623_v19 = vsel %vm700_vm2, %v1585_v17, 0.0  ;;  %v1584_v24 = vadd.f32 %v1536_v61, %v4516_v57 }
 0x730   : > { %1624 = vadd.xlane.f32.xlu0 %v1623_v19  ;;  %v1512_v47 = vpop.f32.mrf.mxu0 }
 0x731   : > { %1566 = vrot.lane.b32.xlu1 %v1539_v46, %s4420_s27  ;;  %v1620_v27 = vsel %vm700_vm2, %v1584_v24, 0.0  ;;  %v1538_v28 = vadd.f32 %v3673_v13, %v1512_v47 }
 0x732   : > { %v4041_v60 = vpop.f32.mrf.mxu0 }
 0x733   : > { %v1541_v23 = vadd.f32 %v4041_v60, %v3673_v13 }
 0x734   : > { %v1522_v30 = vpop.f32.mrf.mxu0 }
 0x735   : > { %v1540_v55 = vadd.f32 %v3673_v13, %v1522_v30 }
 0x755   : > { %1621 = vadd.xlane.f32.xlu1 %v1620_v27 }
 0x766   : > { %1564 = vrot.lane.b32.xlu1 %v1538_v28, %s4420_s27 }
 0x76a   : > { %1568 = vrot.lane.b32.xlu1 %v1540_v55, %s4420_s27  ;;  %v1854_v55 = vld [vmem:[#allocation2 + $0x128] sm:$0xff] }
 0x76b   : > { %4059 = vmatprep.subr.mxu0 %v1854_v55 }
 0x76c   : > { %4060 = vmatpush3.msra.mxu0 %v1854_v55 }
 0x7a3   : > { %v1567_v31 = vpop.permute.xlu1 %1566 }
 0x7a4   : > { %v1587_v32 = vadd.f32 %v1567_v31, %v4584_v8  ;;  %v1853_v31 = vld [vmem:[#allocation2 + $0x120] sm:$0xff] }
 0x7a5   : > { %4061 = vmatprep.subr.mxu0 %v1853_v31 }
 0x7a6   : > { %v1629_v33 = vsel %vm700_vm2, %v1587_v32, 0.0  ;;  %4062 = vmatpush3.msra.mxu0 %v1853_v31 }
 0x7a7   : > { %1630 = vadd.xlane.f32.xlu0 %v1629_v33  ;;  %v1852_v33 = vld [vmem:[#allocation2 + $0x118] sm:$0xff] }
 0x7a8   : > { %4063 = vmatprep.subr.mxu0 %v1852_v33 }
 0x7a9   : > { %4064 = vmatpush3.msra.mxu0 %v1852_v33 }
 0x7b9   : > { %v1625_v26 = vpop.xlane.xlu0 %1624 }
 0x7ba   : > { %v1640_v34 = vmul.f32 0.03125, %v1625_v26 }
 0x7bc   : > { %v1646_v35 = vsub.f32 %v1585_v17, %v1640_v34 }
 0x7be   : > { %v1652_v57 = vmul.f32 %v1646_v35, %v1646_v35 }
 0x7c0   : > { %v1660_v36 = vsel %vm700_vm2, %v1652_v57, 0.0 }
 0x7c1   : > { %1661 = vadd.xlane.f32.xlu1 %v1660_v36  ;;  %v1851_v36 = vld [vmem:[#allocation2 + $0x110] sm:$0xff] }
 0x7c2   : > { %4065 = vmatprep.subr.mxu0 %v1851_v36 }
 0x7c3   : > { %4066 = vmatpush3.msra.mxu0 %v1851_v36 }
 0x7de   : > { %v1622_v37 = vpop.xlane.xlu1 %1621 }
 0x7df   : > { %v1639_v38 = vmul.f32 0.03125, %v1622_v37  ;;  %v1850_v37 = vld [vmem:[#allocation2 + $0x108] sm:$0xff] }
 0x7e0   : > { %4067 = vmatprep.subr.mxu0 %v1850_v37 }
 0x7e1   : > { %v1645_v39 = vsub.f32 %v1584_v24, %v1639_v38  ;;  %4068 = vmatpush3.msra.mxu0 %v1850_v37  ;;  %v1849_v38 = vld [vmem:[#allocation2 + $0x100] sm:$0xff] }
 0x7e2   : > { %v1565_v40 = vpop.permute.xlu1 %1564  ;;  %4069 = vmatprep.subr.mxu0 %v1849_v38 }
 0x7e3   : > { %v1651_v41 = vmul.f32 %v1645_v39, %v1645_v39  ;;  %4070 = vmatpush3.msra.mxu0 %v1849_v38 }
 0x7e5   : > { %v1657_v44 = vsel %vm700_vm2, %v1651_v41, 0.0  ;;  %v1846_v41 = vld [vmem:[#allocation2 + $0xe8] sm:$0xff] }
 0x7e6   : > { %1658 = vadd.xlane.f32.xlu1 %v1657_v44  ;;  %v1569_v45 = vpop.permute.xlu1 %1568  ;;  %v1845_v44 = vld [vmem:[#allocation2 + $0xe0] sm:$0xff] }
 0x7e7   : > { %v4714_v8 = vadd.f32 %v1569_v45, %v4590_v11  ;;  %v1586_v11 = vadd.f32 %v1565_v40, %v4582_v7  ;;  %v1847_v40 = vld [vmem:[#allocation2 + $0xf0] sm:$0xff]  ;;  %v1844_v45 = vld [vmem:[#allocation2 + $0xd8] sm:$0xff] }
 0x7e9   : > { %v1632_v48 = vsel %vm700_vm2, %v4714_v8, 0.0  ;;  %v1626_v63 = vsel %vm700_vm2, %v1586_v11, 0.0 }
 0x7ea   : > { %1633 = vadd.xlane.f32.xlu0 %v1632_v48  ;;  %v1843_v48 = vld [vmem:[#allocation2 + $0xd0] sm:$0xff] }
 0x7f7   : > { %1570 = vrot.lane.b32.xlu1 %v1541_v23, %s4420_s27  ;;  %v4738_v23 = vld [vmem:[%s5097_s5 + $0x4] ss:$0 sm:$0xff] }
 0x81b   : > { %1627 = vadd.xlane.f32.xlu1 %v1626_v63 }
 0x82c   : > { %1611 = vrot.lane.b32.xlu1 %v3675_v0, %s4420_s27 }
 0x830   : > { %v1631_v6 = vpop.xlane.xlu0 %1630 }
 0x831   : > { %v1642_v10 = vmul.f32 0.03125, %v1631_v6 }
 0x833   : > { %v4725_v15 = vsub.f32 %v1587_v32, %v1642_v10 }
 0x835   : > { %v1654_v46 = vmul.f32 %v4725_v15, %v4725_v15 }
 0x837   : > { %v1666_v19 = vsel %vm700_vm2, %v1654_v46, 0.0 }
 0x84a   : > { %v1662_v4 = vpop.xlane.xlu1 %1661 }
 0x84b   : > { %v1676_v5 = vmul.f32 0.03125, %v1662_v4 }
 0x84d   : > { %v1682_v9 = vadd.f32 1e-05, %v1676_v5 }
 0x84f   : > { %4325 = vrsqrt.f32 %v1682_v9 }
 0x85c   : > { %v4326_v47 = vpop.eup %4325 }
 0x85d   : > { %v1694_v60 = vmul.f32 %v4326_v47, %v1646_v35 }
 0x85f   : > { %v1700_v24 = vmul.f32 %v4738_v23, %v1694_v60 }
 0x861   : > { %v4744_v30 = vadd.f32 %v3675_v0, %v1700_v24 }
 0x86f   : > { %v1659_v13 = vpop.xlane.xlu1 %1658 }
 0x870   : > { %v1675_v14 = vmul.f32 0.03125, %v1659_v13 }
 0x872   : > { %v1681_v7 = vadd.f32 1e-05, %v1675_v14 }
 0x873   : > { %v1571_v16 = vpop.permute.xlu1 %1570 }
 0x874   : > { %4327 = vrsqrt.f32 %v1681_v7  ;;  %v4728_v17 = vadd.f32 %v1571_v16, %v4592_v12  ;;  %v4767_v7 = vld [vmem:[%s5097_s5 + $0x6] ss:$0 sm:$0xff] }
 0x876   : > { %v1635_v18 = vsel %vm700_vm2, %v4728_v17, 0.0 }
 0x877   : > { %1636 = vadd.xlane.f32.xlu0 %v1635_v18 }
 0x87b   : > { %1667 = vadd.xlane.f32.xlu0 %v1666_v19 }
 0x881   : > { %v4328_v61 = vpop.eup %4327 }
 0x882   : > { %v1693_v12 = vmul.f32 %v4328_v61, %v1645_v39  ;;  %v1848_v39 = vld [vmem:[#allocation2 + $0xf8] sm:$0xff] }
 0x883   : > { %4071 = vmatprep.subr.mxu0 %v1848_v39 }
 0x884   : > { %v1699_v27 = vmul.f32 %v4738_v23, %v1693_v12  ;;  %4072 = vmatpush3.msra.mxu0 %v1848_v39 }
 0x885   : > { %4073 = vmatprep.subr.mxu0 %v1847_v40 }
 0x886   : > { %v4742_v28 = vadd.f32 %v3675_v0, %v1699_v27  ;;  %4074 = vmatpush3.msra.mxu0 %v1847_v40 }
 0x887   : > { %4075 = vmatprep.subr.mxu0 %v1846_v41 }
 0x888   : > { %4050 = vmatprep.mubr.msk.f32.mxu1 %vm700_vm2, %v4742_v28  ;;  %4076 = vmatpush3.msra.mxu0 %v1846_v41 }
 0x889   : > { %4051 = vmatmul.mubr.msk.f32.vlgmr.msra.gmra.mxu1 %vm700_vm2, %v4744_v30  ;;  %4077 = vmatprep.subr.mxu0 %v1845_v44 }
 0x88a   : > { %4078 = vmatpush3.msra.mxu0 %v1845_v44 }
 0x88b   : > { %4079 = vmatprep.subr.mxu0 %v1844_v45 }
 0x88c   : > { %4080 = vmatpush3.msra.mxu0 %v1844_v45 }
 0x88d   : > { %4081 = vmatprep.subr.mxu0 %v1843_v48 }
 0x88e   : > { %4082 = vmatpush3.msra.mxu0 %v1843_v48 }
 0x88f   : > { %4083 = vmatprep.subr.mxu0 %v1842_v51 }
 0x890   : > { %4084 = vmatpush3.msra.mxu0 %v1842_v51  ;;  %v4813_v51 = vld [vmem:[%s5097_s5 + $0x7] ss:$0 sm:$0xff] }
 0x891   : > { %4085 = vmatprep.subr.mxu0 %v1841_v52 }
 0x892   : > { %4086 = vmatpush3.msra.mxu0 %v1841_v52 }
 0x893   : > { %4087 = vmatprep.subr.mxu0 %v1840_v53 }
 0x894   : > { %4088 = vmatpush3.msra.mxu0 %v1840_v53 }
 0x895   : > { %4089 = vmatprep.subr.mxu0 %v1839_v62 }
 0x896   : > { %4090 = vmatpush3.msra.mxu0 %v1839_v62 }
 0x897   : > { %4137 = vmatprep.subr.msk.mxu0 %vm4602_vm12, %v4421_v22 }
 0x8a4   : > { %v1628_v32 = vpop.xlane.xlu1 %1627 }
 0x8a5   : > { %v1641_v26 = vmul.f32 0.03125, %v1628_v32 }
 0x8a7   : > { %v4750_v34 = vsub.f32 %v1586_v11, %v1641_v26  ;;  %v1634_v11 = vpop.xlane.xlu0 %1633 }
 0x8a8   : > { %v1643_v63 = vmul.f32 0.03125, %v1634_v11 }
 0x8a9   : > { %v1653_v35 = vmul.f32 %v4750_v34, %v4750_v34 }
 0x8aa   : > { %v1649_v5 = vsub.f32 %v4714_v8, %v1643_v63 }
 0x8ab   : > { %v1663_v57 = vsel %vm700_vm2, %v1653_v35, 0.0  ;;  %v1612_v35 = vpop.permute.xlu1 %1611 }
 0x8ac   : > { %1664 = vadd.xlane.f32.xlu0 %v1663_v57  ;;  %v1655_v13 = vmul.f32 %v1649_v5, %v1649_v5 }
 0x8ae   : > { %v1669_v14 = vsel %vm700_vm2, %v1655_v13, 0.0 }
 0x900   : > { %v1637_v0 = vpop.xlane.xlu0 %1636 }
 0x901   : > { %v1644_v4 = vmul.f32 0.03125, %v1637_v0 }
 0x903   : > { %v1650_v6 = vsub.f32 %v4728_v17, %v1644_v4 }
 0x904   : > { %v1668_v20 = vpop.xlane.xlu0 %1667 }
 0x905   : > { %v1656_v9 = vmul.f32 %v1650_v6, %v1650_v6  ;;  %v1678_v21 = vmul.f32 0.03125, %v1668_v20 }
 0x907   : > { %v1672_v10 = vsel %vm700_vm2, %v1656_v9, 0.0 }
 0x908   : > { %1673 = vadd.xlane.f32.xlu0 %v1672_v10 }
 0x90c   : > { %1670 = vadd.xlane.f32.xlu0 %v1669_v14 }
 0x922   : > { %1597 = vrot.lane.b32.xlu0 %v4738_v23, %s4420_s27  ;;  %v1684_v23 = vadd.f32 1e-05, %v1678_v21 }
 0x924   : > { %4329 = vrsqrt.f32 %v1684_v23 }
 0x931   : > { %v4330_v25 = vpop.eup %4329 }
 0x935   : > { %v1665_v47 = vpop.xlane.xlu0 %1664 }
 0x936   : > { %v1677_v60 = vmul.f32 0.03125, %v1665_v47 }
 0x938   : > { %v1683_v61 = vadd.f32 1e-05, %v1677_v60 }
 0x93a   : > { %4331 = vrsqrt.f32 %v1683_v61 }
 0x947   : > { %v4332_v55 = vpop.eup %4331 }
 0x948   : > { %v1695_v29 = vmul.f32 %v4332_v55, %v4750_v34  ;;  %v2118_v55 = vld [vmem:[#allocation2 + $0x138] sm:$0xff] }
 0x949   : > { %v4052_v16 = vpop.f32.mrf.mxu1 }
 0x94a   : > { %v1810_v8 = vadd.f32 %v4052_v16, %v4767_v7 }
 0x94b   : > { %v1804_v17 = vpop.f32.mrf.mxu1 }
 0x94c   : > { %v1805_v18 = vadd.f32 %v4767_v7, %v1804_v17  ;;  %v1834_v19 = vmax.f32 %v1810_v8, 0.0 }
 0x94e   : > { %v1833_v46 = vmax.f32 %v1805_v18, 0.0 }
 0x950   : > { %4091 = vmatprep.mubr.f32.mxu0 %v1833_v46 }
 0x951   : > { %4092 = vmatmul.mubr.f32.vlgmr.msra.gmra.mxu0 %v1834_v19 }
 0x952   : > { %4138 = vmatpush3.msk.msra.mxu0 %vm4602_vm12, %v4421_v22 }
 0x953   : > { %4139 = vmatprep.subr.msk.mxu0 %vm4606_vm13, %v4421_v22 }
 0x954   : > { %4140 = vmatpush3.msk.msra.mxu0 %vm4606_vm13, %v4421_v22 }
 0x955   : > { %4141 = vmatprep.subr.msk.mxu0 %vm4616_vm14, %v4421_v22 }
 0x956   : > { %4142 = vmatpush3.msk.msra.mxu0 %vm4616_vm14, %v4421_v22 }
 0x957   : > { %4143 = vmatprep.subr.msk.mxu0 %vm4633_vm15, %v4421_v22 }
 0x958   : > { %4144 = vmatpush3.msk.msra.mxu0 %vm4633_vm15, %v4421_v22  ;;  %v1696_v22 = vmul.f32 %v4330_v25, %v4725_v15 }
 0x991   : > { %v1674_v12 = vpop.xlane.xlu0 %1673 }
 0x992   : > { %v1680_v24 = vmul.f32 0.03125, %v1674_v12 }
 0x994   : > { %v1686_v27 = vadd.f32 1e-05, %v1680_v24 }
 0x995   : > { %v1671_v31 = vpop.xlane.xlu0 %1670 }
 0x996   : > { %4333 = vrsqrt.f32 %v1686_v27  ;;  %v1679_v32 = vmul.f32 0.03125, %v1671_v31  ;;  %v2120_v27 = vld [vmem:[#allocation2 + $0x148] sm:$0xff]  ;;  %v2117_v31 = vld [vmem:[#allocation2 + $0x130] sm:$0xff] }
 0x997   : > { %4100 = vmatprep.subr.mxu1 %v2120_v27 }
 0x998   : > { %v1685_v33 = vadd.f32 1e-05, %v1679_v32  ;;  %4101 = vmatpush3.msra.mxu1 %v2120_v27 }
 0x999   : > { %v1598_v26 = vpop.permute.xlu0 %1597 }
 0x99a   : > { %4335 = vrsqrt.f32 %v1685_v33  ;;  %v1701_v57 = vmul.f32 %v1695_v29, %v1598_v26  ;;  %v1702_v36 = vmul.f32 %v1696_v22, %v1598_v26 }
 0x99c   : > { %v4794_v37 = vadd.f32 %v1701_v57, %v1612_v35  ;;  %v4796_v38 = vadd.f32 %v1702_v36, %v1612_v35 }
 0x99e   : > { %4053 = vmatprep.mubr.msk.f32.mxu1 %vm700_vm2, %v4794_v37 }
 0x99f   : > { %4054 = vmatmul.mubr.msk.f32.gmra.mxu1 %vm700_vm2, %v4796_v38 }
 0x9a3   : > { %v4334_v39 = vpop.eup %4333 }
 0x9a4   : > { %v1698_v40 = vmul.f32 %v4334_v39, %v1650_v6 }
 0x9a6   : > { %v1704_v15 = vmul.f32 %v1698_v40, %v1598_v26 }
 0x9a7   : > { %v4336_v34 = vpop.eup %4335 }
 0x9a8   : > { %v1697_v41 = vmul.f32 %v4336_v34, %v1649_v5  ;;  %v4804_v48 = vadd.f32 %v1704_v15, %v1612_v35 }
 0x9aa   : > { %v1703_v44 = vmul.f32 %v1697_v41, %v1598_v26 }
 0x9ac   : > { %v4802_v45 = vadd.f32 %v1703_v44, %v1612_v35 }
 0x9ae   : > { %4056 = vmatprep.mubr.msk.f32.mxu1 %vm700_vm2, %v4802_v45 }
 0x9af   : > { %4057 = vmatmul.mubr.msk.f32.gmra.mxu1 %vm700_vm2, %v4804_v48 }
 0xa11   : > { %v4093_v52 = vpop.f32.mrf.mxu0 }
 0xa12   : > { %v1956_v53 = vadd.f32 %v4093_v52, %v4813_v51 }
 0xa13   : > { %v1921_v62 = vpop.f32.mrf.mxu0 }
 0xa14   : > { %v1955_v11 = vadd.f32 %v4813_v51, %v1921_v62  ;;  %v1994_v63 = vadd.f32 %v1956_v53, %v4744_v30  ;;  %v3684_v62 = vld [vmem:[%s5097_s5 + $0x8] ss:$0 sm:$0xff] }
 0xa16   : > { %v2030_v0 = vsel %vm700_vm2, %v1994_v63, 0.0  ;;  %v1993_v4 = vadd.f32 %v1955_v11, %v4742_v28 }
 0xa17   : > { %2031 = vadd.xlane.f32.xlu0 %v2030_v0 }
 0xa18   : > { %v2027_v5 = vsel %vm700_vm2, %v1993_v4, 0.0 }
 0xa19   : > { %2028 = vadd.xlane.f32.xlu1 %v2027_v5 }
 0xa5f   : > { %v4055_v6 = vpop.f32.mrf.mxu1 }
 0xa60   : > { %v1820_v9 = vadd.f32 %v4055_v6, %v4767_v7 }
 0xa61   : > { %v1814_v10 = vpop.f32.mrf.mxu1 }
 0xa62   : > { %v1815_v13 = vadd.f32 %v4767_v7, %v1814_v10  ;;  %v1836_v16 = vmax.f32 %v1820_v9, 0.0 }
 0xa64   : > { %v1835_v14 = vmax.f32 %v1815_v13, 0.0 }
 0xa66   : > { %4094 = vmatprep.mubr.f32.mxu0 %v1835_v14 }
 0xa67   : > { %4095 = vmatmul.mubr.f32.gmra.mxu0 %v1836_v16 }
 0xa6f   : > { %v4058_v8 = vpop.f32.mrf.mxu1 }
 0xa70   : > { %v1830_v30 = vadd.f32 %v4058_v8, %v4767_v7 }
 0xa71   : > { %v1824_v17 = vpop.f32.mrf.mxu1 }
 0xa72   : > { %v1825_v28 = vadd.f32 %v4767_v7, %v1824_v17  ;;  %v1838_v46 = vmax.f32 %v1830_v30, 0.0  ;;  %v2119_v7 = vld [vmem:[#allocation2 + $0x140] sm:$0xff] }
 0xa73   : > { %4102 = vmatprep.subr.mxu1 %v2119_v7 }
 0xa74   : > { %v1837_v18 = vmax.f32 %v1825_v28, 0.0  ;;  %4103 = vmatpush3.msra.mxu1 %v2119_v7 }
 0xa75   : > { %4104 = vmatprep.subr.mxu1 %v2118_v55 }
 0xa76   : > { %4097 = vmatprep.mubr.f32.mxu0 %v1837_v18  ;;  %4105 = vmatpush3.msra.mxu1 %v2118_v55 }
 0xa77   : > { %4098 = vmatmul.mubr.f32.gmra.mxu0 %v1838_v46  ;;  %4106 = vmatprep.subr.mxu1 %v2117_v31 }
 0xa78   : > { %4107 = vmatpush3.msra.mxu1 %v2117_v31 }
 0xaa0   : > { %v2032_v19 = vpop.xlane.xlu0 %2031 }
 0xaa1   : > { %v2046_v20 = vmul.f32 0.03125, %v2032_v19 }
 0xaa2   : > { %v2029_v47 = vpop.xlane.xlu1 %2028 }
 0xaa3   : > { %v2052_v21 = vsub.f32 %v1994_v63, %v2046_v20  ;;  %v2045_v60 = vmul.f32 0.03125, %v2029_v47 }
 0xaa5   : > { %v2051_v23 = vsub.f32 %v1993_v4, %v2045_v60  ;;  %v2058_v61 = vmul.f32 %v2052_v21, %v2052_v21  ;;  %v3685_v4 = vld [vmem:[%s5097_s5 + $0x9] ss:$0 sm:$0xff] }
 0xaa7   : > { %v2066_v12 = vsel %vm700_vm2, %v2058_v61, 0.0  ;;  %v2057_v24 = vmul.f32 %v2051_v23, %v2051_v23 }
 0xaa8   : > { %2067 = vadd.xlane.f32.xlu1 %v2066_v12 }
 0xaa9   : > { %v2063_v25 = vsel %vm700_vm2, %v2057_v24, 0.0 }
 0xaaa   : > { %2064 = vadd.xlane.f32.xlu0 %v2063_v25 }
 0xb27   : > { %v4096_v32 = vpop.f32.mrf.mxu0 }
 0xb28   : > { %v1958_v33 = vadd.f32 %v4096_v32, %v4813_v51 }
 0xb29   : > { %v1931_v29 = vpop.f32.mrf.mxu0 }
 0xb2a   : > { %v1957_v22 = vadd.f32 %v4813_v51, %v1931_v29  ;;  %1973 = vrot.lane.b32.xlu1 %v1958_v33, %s4420_s27 }
 0xb2c   : > { %1971 = vrot.lane.b32.xlu0 %v1957_v22, %s4420_s27 }
 0xb31   : > { %v2068_v26 = vpop.xlane.xlu1 %2067 }
 0xb32   : > { %v2082_v35 = vmul.f32 0.03125, %v2068_v26 }
 0xb33   : > { %v2065_v57 = vpop.xlane.xlu0 %2064 }
 0xb34   : > { %v2088_v36 = vadd.f32 1e-05, %v2082_v35  ;;  %v2081_v39 = vmul.f32 0.03125, %v2065_v57 }
 0xb36   : > { %4337 = vrsqrt.f32 %v2088_v36  ;;  %v2087_v40 = vadd.f32 1e-05, %v2081_v39 }
 0xb37   : > { %v4099_v34 = vpop.f32.mrf.mxu0 }
 0xb38   : > { %4339 = vrsqrt.f32 %v2087_v40  ;;  %v1960_v41 = vadd.f32 %v4099_v34, %v4813_v51 }
 0xb39   : > { %v1941_v15 = vpop.f32.mrf.mxu0 }
 0xb3a   : > { %v1959_v44 = vadd.f32 %v4813_v51, %v1941_v15  ;;  %1977 = vrot.lane.b32.xlu0 %v1960_v41, %s4420_s27 }
 0xb3c   : > { %1975 = vrot.lane.b32.xlu1 %v1959_v44, %s4420_s27 }
 0xb43   : > { %v4338_v52 = vpop.eup %4337 }
 0xb44   : > { %v2100_v53 = vmul.f32 %v4338_v52, %v2052_v21 }
 0xb45   : > { %v4340_v11 = vpop.eup %4339 }
 0xb46   : > { %v2099_v63 = vmul.f32 %v4340_v11, %v2051_v23  ;;  %v2106_v0 = vmul.f32 %v3684_v62, %v2100_v53 }
 0xb48   : > { %v2105_v5 = vmul.f32 %v3684_v62, %v2099_v63  ;;  %v4843_v51 = vadd.f32 %v3685_v4, %v2106_v0 }
 0xb4a   : > { %v4841_v6 = vadd.f32 %v3685_v4, %v2105_v5 }
 0xb4c   : > { %4108 = vmatprep.mubr.msk.f32.mxu1 %vm700_vm2, %v4841_v6 }
 0xb4d   : > { %4109 = vmatmul.mubr.msk.f32.vlgmr.msra.gmra.mxu1 %vm700_vm2, %v4843_v51 }
 0xb9c   : > { %v1974_v9 = vpop.permute.xlu1 %1973 }
 0xb9d   : > { %v1996_v10 = vadd.f32 %v1974_v9, %v4796_v38 }
 0xb9e   : > { %v1972_v13 = vpop.permute.xlu0 %1971 }
 0xb9f   : > { %v1995_v14 = vadd.f32 %v1972_v13, %v4794_v37  ;;  %v2036_v16 = vsel %vm700_vm2, %v1996_v10, 0.0 }
 0xba0   : > { %2037 = vadd.xlane.f32.xlu0 %v2036_v16 }
 0xba1   : > { %v2033_v8 = vsel %vm700_vm2, %v1995_v14, 0.0 }
 0xba2   : > { %2034 = vadd.xlane.f32.xlu1 %v2033_v8 }
 0xbac   : > { %v1978_v30 = vpop.permute.xlu0 %1977 }
 0xbad   : > { %v1998_v17 = vadd.f32 %v1978_v30, %v4804_v48 }
 0xbae   : > { %v1976_v28 = vpop.permute.xlu1 %1975 }
 0xbaf   : > { %v1997_v18 = vadd.f32 %v1976_v28, %v4802_v45  ;;  %v2042_v46 = vsel %vm700_vm2, %v1998_v17, 0.0 }
 0xbb0   : > { %2043 = vadd.xlane.f32.xlu1 %v2042_v46 }
 0xbb1   : > { %v2039_v38 = vsel %vm700_vm2, %v1997_v18, 0.0 }
 0xbb2   : > { %2040 = vadd.xlane.f32.xlu0 %v2039_v38 }
 0xc0d   : > { %v4110_v19 = vpop.f32.mrf.mxu1 }
 0xc0e   : > { %4117 = vmatprep.subr.mxu1 %v4110_v19 }
 0xc0f   : > { %v2205_v37 = vpop.f32.mrf.mxu1  ;;  %4118 = vmatpush3.msra.mxu1 %v4110_v19 }
 0xc10   : > { %4119 = vmatprep.subr.mxu1 %v2205_v37 }
 0xc11   : > { %4120 = vmatpush3.msra.mxu1 %v2205_v37 }
 0xc29   : > { %v2038_v20 = vpop.xlane.xlu0 %2037 }
 0xc2a   : > { %v2048_v47 = vmul.f32 0.03125, %v2038_v20 }
 0xc2b   : > { %v2035_v21 = vpop.xlane.xlu1 %2034 }
 0xc2c   : > { %v2054_v60 = vsub.f32 %v1996_v10, %v2048_v47  ;;  %v2047_v48 = vmul.f32 0.03125, %v2035_v21 }
 0xc2e   : > { %v2053_v23 = vsub.f32 %v1995_v14, %v2047_v48  ;;  %v2060_v61 = vmul.f32 %v2054_v60, %v2054_v60 }
 0xc30   : > { %v2072_v45 = vsel %vm700_vm2, %v2060_v61, 0.0  ;;  %v2059_v12 = vmul.f32 %v2053_v23, %v2053_v23 }
 0xc31   : > { %2073 = vadd.xlane.f32.xlu1 %v2072_v45 }
 0xc32   : > { %v2069_v24 = vsel %vm700_vm2, %v2059_v12, 0.0 }
 0xc33   : > { %2070 = vadd.xlane.f32.xlu0 %v2069_v24 }
 0xc39   : > { %v2044_v25 = vpop.xlane.xlu1 %2043 }
 0xc3a   : > { %v2050_v27 = vmul.f32 0.03125, %v2044_v25 }
 0xc3b   : > { %v2041_v7 = vpop.xlane.xlu0 %2040 }
 0xc3c   : > { %v2056_v55 = vsub.f32 %v1998_v17, %v2050_v27  ;;  %v2049_v31 = vmul.f32 0.03125, %v2041_v7 }
 0xc3e   : > { %v2055_v32 = vsub.f32 %v1997_v18, %v2049_v31  ;;  %v2062_v33 = vmul.f32 %v2056_v55, %v2056_v55 }
 0xc40   : > { %v2078_v29 = vsel %vm700_vm2, %v2062_v33, 0.0  ;;  %v2061_v22 = vmul.f32 %v2055_v32, %v2055_v32 }
 0xc41   : > { %2079 = vadd.xlane.f32.xlu1 %v2078_v29 }
 0xc42   : > { %v2075_v26 = vsel %vm700_vm2, %v2061_v22, 0.0 }
 0xc43   : > { %2076 = vadd.xlane.f32.xlu0 %v2075_v26 }
 0xc52   : > { %2018 = vrot.lane.b32.xlu1 %v3685_v4, %s4420_s27 }
 0xc56   : > { %2323 = vrot.lane.b32.xlu1 %v4110_v19, %s4420_s27 }
 0xc59   : > { %2004 = vrot.lane.b32.xlu0 %v3684_v62, %s4420_s27 }
 0xc5d   : > { %2321 = vrot.lane.b32.xlu0 %v2205_v37, %s4420_s27 }
 0xcba   : > { %v2074_v35 = vpop.xlane.xlu1 %2073 }
 0xcbb   : > { %v2084_v57 = vmul.f32 0.03125, %v2074_v35 }
 0xcbc   : > { %v2071_v36 = vpop.xlane.xlu0 %2070 }
 0xcbd   : > { %v2090_v39 = vadd.f32 1e-05, %v2084_v57  ;;  %v2083_v40 = vmul.f32 0.03125, %v2071_v36 }
 0xcbf   : > { %4341 = vrsqrt.f32 %v2090_v39  ;;  %v2089_v34 = vadd.f32 1e-05, %v2083_v40 }
 0xcc1   : > { %4343 = vrsqrt.f32 %v2089_v34 }
 0xcca   : > { %v2080_v41 = vpop.xlane.xlu1 %2079 }
 0xccb   : > { %v2086_v15 = vmul.f32 0.03125, %v2080_v41 }
 0xccc   : > { %v4342_v44 = vpop.eup %4341  ;;  %v2077_v52 = vpop.xlane.xlu0 %2076 }
 0xccd   : > { %v2092_v53 = vadd.f32 1e-05, %v2086_v15  ;;  %v2085_v11 = vmul.f32 0.03125, %v2077_v52  ;;  %v2102_v5 = vmul.f32 %v4342_v44, %v2054_v60 }
 0xcce   : > { %v4344_v63 = vpop.eup %4343  ;;  %v2019_v0 = vpop.permute.xlu1 %2018 }
 0xccf   : > { %4345 = vrsqrt.f32 %v2092_v53  ;;  %v2091_v62 = vadd.f32 1e-05, %v2085_v11  ;;  %v2101_v4 = vmul.f32 %v4344_v63, %v2053_v23 }
 0xcd0   : > { %v2005_v9 = vpop.permute.xlu0 %2004 }
 0xcd1   : > { %4347 = vrsqrt.f32 %v2091_v62  ;;  %v2107_v10 = vmul.f32 %v2101_v4, %v2005_v9  ;;  %v2108_v13 = vmul.f32 %v2102_v5, %v2005_v9 }
 0xcd2   : > { %v2324_v14 = vpop.permute.xlu1 %2323 }
 0xcd3   : > { %4127 = vmatprep.subr.mxu1 %v2324_v14  ;;  %v4865_v16 = vadd.f32 %v2107_v10, %v2019_v0  ;;  %v4867_v8 = vadd.f32 %v2108_v13, %v2019_v0 }
 0xcd4   : > { %v2322_v20 = vpop.permute.xlu0 %2321 }
 0xcd5   : > { %4111 = vmatprep.mubr.msk.f32.mxu1 %vm700_vm2, %v4865_v16 }
 0xcd6   : > { %4112 = vmatmul.mubr.msk.f32.gmra.mxu1 %vm700_vm2, %v4867_v8 }
 0xcdc   : > { %v4346_v30 = vpop.eup %4345 }
 0xcdd   : > { %v2104_v17 = vmul.f32 %v4346_v30, %v2056_v55 }
 0xcde   : > { %v4348_v28 = vpop.eup %4347 }
 0xcdf   : > { %v2103_v18 = vmul.f32 %v4348_v28, %v2055_v32  ;;  %v2110_v46 = vmul.f32 %v2104_v17, %v2005_v9 }
 0xce1   : > { %v2109_v38 = vmul.f32 %v2103_v18, %v2005_v9  ;;  %v4875_v37 = vadd.f32 %v2110_v46, %v2019_v0 }
 0xce3   : > { %v4873_v19 = vadd.f32 %v2109_v38, %v2019_v0 }
 0xce5   : > { %4114 = vmatprep.mubr.msk.f32.mxu1 %vm700_vm2, %v4873_v19 }
 0xce6   : > { %4115 = vmatmul.mubr.msk.f32.gmra.mxu1 %vm700_vm2, %v4875_v37 }
 0xce7   : > { %4121 = vmatprep.mubr.msk.f32.mxu1 %vm915_vm4, %v4530_v50 }
 0xcea   : > { %4122 = vmatmul.mubr.msk.f32.vlgmr.msra.gmra.mxu1 %vm915_vm4, %v4539_v54 }
 0xceb   : > { %4128 = vmatpush3.msra.mxu1 %v2324_v14  ;;  %4124 = vmatprep.mubr.msk.f32.mxu1 %vm915_vm4, %v4544_v56 }
 0xcec   : > { %4129 = vmatprep.subr.mxu1 %v2322_v20 }
 0xced   : > { %4130 = vmatpush3.msra.mxu1 %v2322_v20 }
 0xcee   : > { %4125 = vmatmul.mubr.msk.f32.gmra.mxu1 %vm915_vm4, %v4552_v58 }
 0xcef   : > { %4131 = vmatprep.mubr.msk.f32.mxu1 %vm915_vm4, %v4555_v59 }
 0xcf2   : > { %4132 = vmatmul.mubr.msk.f32.vlgmr.msra.gmra.mxu1 %vm915_vm4, %v4564_v1 }
 0xcf3   : > { %4134 = vmatprep.mubr.msk.f32.mxu1 %vm915_vm4, %v4567_v2 }
 0xcf6   : > { %4135 = vmatmul.mubr.msk.f32.gmra.mxu1 %vm915_vm4, %v4575_v3 }
 0xcf7   : > { %4159 = vmatprep.mubr.msk.f32.mxu1 %vm700_vm2, %v4679_v42 }
 0xd96   : > { %v4113_v50 = vpop.f32.mrf.mxu1 }
 0xd97   : > { %2426 = vrot.lane.b32.xlu0 %v4113_v50, %s4422_s30 }
 0xd98   : > { %v2215_v54 = vpop.f32.mrf.mxu1 }
 0xd99   : > { %2424 = vrot.lane.b32.xlu1 %v2215_v54, %s4422_s30 }
 0xda6   : > { %v4116_v56 = vpop.f32.mrf.mxu1 }
 0xda7   : > { %2430 = vrot.lane.b32.xlu0 %v4116_v56, %s4422_s30 }
 0xda8   : > { %v2225_v58 = vpop.f32.mrf.mxu1 }
 0xda9   : > { %2428 = vrot.lane.b32.xlu1 %v2225_v58, %s4422_s30 }
 0xdaa   : > { %v4123_v59 = vpop.f32.mrf.mxu1 }
 0xdac   : > { %v2300_v1 = vpop.f32.mrf.mxu1 }
 0xdae   : > { %v4126_v2 = vpop.f32.mrf.mxu1 }
 0xdb0   : > { %v2310_v47 = vpop.f32.mrf.mxu1 }
 0xdb2   : > { %v4133_v3 = vpop.f32.mrf.mxu1 }
 0xdb3   : > { %v2413_v21 = vmul.f32 %v4133_v3, %v4123_v59  ;;  %2559 = vrot.lane.b32.xlu0 %v4133_v3, %s4420_s27  ;;  %v2685_v59 = vld [vmem:[#allocation2 + $0x168] sm:$0xff] }
 0xdb4   : > { %v2393_v42 = vpop.f32.mrf.mxu1  ;;  %4162 = vmatprep.subr.mxu0 %v2685_v59 }
 0xdb5   : > { %v2412_v60 = vmul.f32 %v2393_v42, %v2300_v1  ;;  %v2417_v24 = vmul.f32 0.35355338, %v2413_v21  ;;  %v2684_v1 = vld [vmem:[#allocation2 + $0x160] sm:$0xff] }
 0xdb6   : > { %v4136_v48 = vpop.f32.mrf.mxu1 }
 0xdb7   : > { %v2415_v23 = vmul.f32 %v4136_v48, %v4126_v2  ;;  %2563 = vrot.lane.b32.xlu1 %v4136_v48, %s4420_s27  ;;  %v2416_v45 = vmul.f32 0.35355338, %v2412_v60  ;;  %v2682_v60 = vld [vmem:[#allocation2 + $0x150] sm:$0xff] }
 0xdb8   : > { %v2403_v61 = vpop.f32.mrf.mxu1 }
 0xdb9   : > { %2561 = vrot.lane.b32.xlu0 %v2403_v61, %s4420_s27  ;;  %v2414_v55 = vmul.f32 %v2403_v61, %v2310_v47  ;;  %v2419_v33 = vmul.f32 0.35355338, %v2415_v23 }
 0xdbb   : > { %v2418_v31 = vmul.f32 0.35355338, %v2414_v55 }
 0xdbd   : > { %2557 = vrot.lane.b32.xlu0 %v2393_v42, %s4420_s27  ;;  %v2683_v42 = vld [vmem:[#allocation2 + $0x158] sm:$0xff] }
 0xe09   : > { %v2427_v12 = vpop.permute.xlu0 %2426 }
 0xe0a   : > { %v4909_v7 = vmul.f32 %v2427_v12, %v2417_v24  ;;  %v3720_v24 = vld [vmem:[%s5097_s5 + $0xa] ss:$0 sm:$0xff] }
 0xe0b   : > { %v2425_v25 = vpop.permute.xlu1 %2424 }
 0xe0c   : > { %v4907_v27 = vmul.f32 %v2425_v25, %v2416_v45 }
 0xe0e   : > { %4145 = vmatprep.mubr.msk.f32.mxu0 %vm700_vm2, %v4907_v27 }
 0xe0f   : > { %4146 = vmatmul.mubr.msk.f32.vlgmr.msra.gmra.mxu0 %vm700_vm2, %v4909_v7 }
 0xe10   : > { %4163 = vmatpush3.msra.mxu0 %v2685_v59 }
 0xe11   : > { %4164 = vmatprep.subr.mxu0 %v2684_v1 }
 0xe12   : > { %4165 = vmatpush3.msra.mxu0 %v2684_v1 }
 0xe13   : > { %4166 = vmatprep.subr.mxu0 %v2683_v42 }
 0xe14   : > { %4167 = vmatpush3.msra.mxu0 %v2683_v42  ;;  %v4971_v42 = vld [vmem:[%s5097_s5 + $0xb] ss:$0 sm:$0xff] }
 0xe15   : > { %4168 = vmatprep.subr.mxu0 %v2682_v60 }
 0xe16   : > { %4169 = vmatpush3.msra.mxu0 %v2682_v60 }
 0xe19   : > { %v2431_v32 = vpop.permute.xlu0 %2430 }
 0xe1a   : > { %v4917_v26 = vmul.f32 %v2431_v32, %v2419_v33 }
 0xe1b   : > { %v2429_v29 = vpop.permute.xlu1 %2428 }
 0xe1c   : > { %v4915_v22 = vmul.f32 %v2429_v29, %v2418_v31 }
 0xe1e   : > { %4148 = vmatprep.mubr.msk.f32.mxu0 %vm700_vm2, %v4915_v22 }
 0xe1f   : > { %4149 = vmatmul.mubr.msk.f32.gmra.mxu0 %vm700_vm2, %v4917_v26 }
 0xe25   : > { %v2560_v5 = vpop.permute.xlu0 %2559 }
 0xe29   : > { %v2564_v9 = vpop.permute.xlu1 %2563 }
 0xe2b   : > { %v2562_v10 = vpop.permute.xlu0 %2561 }
 0xe2f   : > { %v2558_v28 = vpop.permute.xlu0 %2557 }
 0xecf   : > { %v4147_v35 = vpop.f32.mrf.mxu0 }
 0xed0   : > { %v3709_v53 = vclamps-f32 %v4147_v35, 5.0 }
 0xed1   : > { %v2518_v57 = vpop.f32.mrf.mxu0 }
 0xed2   : > { %v3708_v36 = vclamps-f32 %v2518_v57, 5.0  ;;  %v2547_v63 = vmul.f32 1.442695, %v3709_v53 }
 0xed4   : > { %v2545_v39 = vmul.f32 1.442695, %v3708_v36 }
 0xed6   : > { %4349 = vpow2.f32 %v2545_v39 }
 0xedf   : > { %v4150_v40 = vpop.f32.mrf.mxu0 }
 0xee0   : > { %v3711_v34 = vclamps-f32 %v4150_v40, 5.0 }
 0xee1   : > { %v2528_v41 = vpop.f32.mrf.mxu0 }
 0xee2   : > { %v2551_v15 = vmul.f32 1.442695, %v3711_v34  ;;  %v3710_v44 = vclamps-f32 %v2528_v41, 5.0 }
 0xee3   : > { %v4350_v52 = vpop.eup %4349 }
 0xee4   : > { %4351 = vpow2.f32 %v2551_v15  ;;  %v2549_v11 = vmul.f32 1.442695, %v3710_v44  ;;  %2577 = vrot.lane.b32.xlu0 %v4350_v52, %s4422_s30  ;;  %v2569_v56 = vmul.f32 %v4350_v52, %v2558_v28  ;;  %v3092_v28 = vld [vmem:[#allocation2 + $0x1e0] sm:$0xff] }
 0xee6   : > { %4353 = vpow2.f32 %v2549_v11 }
 0xee7   : > { %4355 = vpow2.f32 %v2547_v63 }
 0xef1   : > { %v4352_v0 = vpop.eup %4351 }
 0xef2   : > { %2583 = vrot.lane.b32.xlu1 %v4352_v0, %s4422_s30  ;;  %v2572_v13 = vmul.f32 %v4352_v0, %v2564_v9  ;;  %v2954_v9 = vld [vmem:[#allocation2 + $0x170] sm:$0xff] }
 0xef3   : > { %v4354_v62 = vpop.eup %4353 }
 0xef4   : > { %v4356_v4 = vpop.eup %4355  ;;  %v2571_v17 = vmul.f32 %v4354_v62, %v2562_v10  ;;  %v3097_v10 = vld [vmem:[#allocation2 + $0x208] sm:$0xff] }
 0xef5   : > { %v2570_v38 = vmul.f32 %v4356_v4, %v2560_v5  ;;  %v2955_v5 = vld [vmem:[#allocation2 + $0x178] sm:$0xff]  ;;  %4196 = vmatprep.subr.mxu0 %v3097_v10 }
 0xef6   : > { %2581 = vrot.lane.b32.xlu1 %v4354_v62, %s4422_s30  ;;  %v2957_v62 = vld [vmem:[#allocation2 + $0x188] sm:$0xff] }
 0xefa   : > { %2579 = vrot.lane.b32.xlu1 %v4356_v4, %s4422_s30  ;;  %v2956_v4 = vld [vmem:[#allocation2 + $0x180] sm:$0xff] }
 0xf56   : > { %v2578_v20 = vpop.permute.xlu0 %2577 }
 0xf57   : > { %v2589_v58 = vsel %vm700_vm2, %v2569_v56, %v2578_v20  ;;  %v3088_v20 = vld [vmem:[#allocation2 + $0x1c0] sm:$0xff] }
 0xf64   : > { %v2584_v14 = vpop.permute.xlu1 %2583 }
 0xf65   : > { %v2592_v30 = vsel %vm700_vm2, %v2572_v13, %v2584_v14  ;;  %v3096_v13 = vld [vmem:[#allocation2 + $0x200] sm:$0xff]  ;;  %v3095_v14 = vld [vmem:[#allocation2 + $0x1f8] sm:$0xff] }
 0xf66   : > { %4151 = vmatprep.subr.mxu1 %v2592_v30 }
 0xf67   : > { %4152 = vmatpush3.msra.mxu1 %v2592_v30  ;;  %v3094_v30 = vld [vmem:[#allocation2 + $0x1f0] sm:$0xff] }
 0xf68   : > { %v2582_v18 = vpop.permute.xlu1 %2581 }
 0xf69   : > { %v2591_v46 = vsel %vm700_vm2, %v2571_v17, %v2582_v18  ;;  %v3093_v17 = vld [vmem:[#allocation2 + $0x1e8] sm:$0xff]  ;;  %v3091_v18 = vld [vmem:[#allocation2 + $0x1d8] sm:$0xff] }
 0xf6a   : > { %4153 = vmatprep.subr.mxu1 %v2591_v46 }
 0xf6b   : > { %4154 = vmatpush3.msra.mxu1 %v2591_v46  ;;  %v3090_v46 = vld [vmem:[#allocation2 + $0x1d0] sm:$0xff] }
 0xf6c   : > { %v2580_v50 = vpop.permute.xlu1 %2579 }
 0xf6d   : > { %v2590_v54 = vsel %vm700_vm2, %v2570_v38, %v2580_v50  ;;  %v3089_v38 = vld [vmem:[#allocation2 + $0x1c8] sm:$0xff]  ;;  %v3087_v50 = vld [vmem:[#allocation2 + $0x1b8] sm:$0xff] }
 0xf6e   : > { %4155 = vmatprep.subr.mxu1 %v2590_v54 }
 0xf6f   : > { %4156 = vmatpush3.msra.mxu1 %v2590_v54  ;;  %v3086_v54 = vld [vmem:[#allocation2 + $0x1b0] sm:$0xff] }
 0xf70   : > { %4157 = vmatprep.subr.mxu1 %v2589_v58 }
 0xf71   : > { %4158 = vmatpush3.msra.mxu1 %v2589_v58 }
 0xf72   : > { %4160 = vmatmul.mubr.msk.f32.vlgmr.msra.gmra.mxu1 %vm700_vm2, %v4683_v43  ;;  %4179 = vmatprep.subr.mxu1 %v2957_v62 }
 0xf73   : > { %4180 = vmatpush3.msra.mxu1 %v2957_v62 }
 0xf74   : > { %4181 = vmatprep.subr.mxu1 %v2956_v4 }
 0xf75   : > { %4182 = vmatpush3.msra.mxu1 %v2956_v4 }
 0xf76   : > { %4183 = vmatprep.subr.mxu1 %v2955_v5 }
 0xf77   : > { %4184 = vmatpush3.msra.mxu1 %v2955_v5 }
 0xf78   : > { %4185 = vmatprep.subr.mxu1 %v2954_v9 }
 0xf79   : > { %4186 = vmatpush3.msra.mxu1 %v2954_v9 }
 0xf7a   : > { %4237 = vmatprep.subr.mxu1 %v4419_v49 }
0x1032   : > { %v4161_v2 = vpop.f32.mrf.mxu1 }
0x1033   : > { %v2669_v47 = vadd.f32 1e-06, %v4161_v2 }
0x1034   : > { %v2659_v3 = vpop.f32.mrf.mxu1 }
0x1035   : > { %4357 = vrcp.f32 %v2669_v47  ;;  %v2668_v21 = vadd.f32 1e-06, %v2659_v3 }
0x1037   : > { %4359 = vrcp.f32 %v2668_v21 }
0x1042   : > { %v4358_v48 = vpop.eup %4357 }
0x1043   : > { %2676 = vrot.lane.b32.xlu0 %v4358_v48, %s4420_s27 }
0x1044   : > { %v4360_v43 = vpop.eup %4359 }
0x1045   : > { %2674 = vrot.lane.b32.xlu1 %v4360_v43, %s4420_s27 }
0x10b5   : > { %v2677_v23 = vpop.permute.xlu0 %2676 }
0x10b6   : > { %v2681_v12 = vmul.f32 %v4161_v2, %v2677_v23  ;;  %v4978_v23 = vld [vmem:[%s5097_s5 + $0xc] ss:$0 sm:$0xff] }
0x10b7   : > { %v2675_v61 = vpop.permute.xlu1 %2674 }
0x10b8   : > { %v2680_v45 = vmul.f32 %v2675_v61, %v2659_v3 }
0x10ba   : > { %4170 = vmatprep.mubr.msk.f32.mxu0 %vm700_vm2, %v2680_v45 }
0x10bb   : > { %4171 = vmatmul.mubr.msk.f32.vlgmr.msra.gmra.mxu0 %vm700_vm2, %v2681_v12 }
0x10bc   : > { %4173 = vmatprep.mubr.msk.f32.mxu0 %vm700_vm2, %v4907_v27  ;;  %4197 = vmatpush3.msra.mxu0 %v3097_v10 }
0x10bd   : > { %4198 = vmatprep.subr.mxu0 %v3096_v13 }
0x10be   : > { %4199 = vmatpush3.msra.mxu0 %v3096_v13 }
0x10bf   : > { %4174 = vmatmul.mubr.msk.f32.gmra.mxu0 %vm700_vm2, %v4909_v7  ;;  %4200 = vmatprep.subr.mxu0 %v3095_v14 }
0x10c0   : > { %4176 = vmatprep.mubr.msk.f32.mxu0 %vm700_vm2, %v4915_v22  ;;  %4201 = vmatpush3.msra.mxu0 %v3095_v14 }
0x10c1   : > { %4202 = vmatprep.subr.mxu0 %v3094_v30 }
0x10c2   : > { %4203 = vmatpush3.msra.mxu0 %v3094_v30 }
0x10c3   : > { %4177 = vmatmul.mubr.msk.f32.gmra.mxu0 %vm700_vm2, %v4917_v26  ;;  %4204 = vmatprep.subr.mxu0 %v3093_v17 }
0x10c4   : > { %4205 = vmatpush3.msra.mxu0 %v3093_v17 }
0x10c5   : > { %4206 = vmatprep.subr.mxu0 %v3092_v28 }
0x10c6   : > { %4207 = vmatpush3.msra.mxu0 %v3092_v28 }
0x10c7   : > { %4208 = vmatprep.subr.mxu0 %v3091_v18 }
0x10c8   : > { %4209 = vmatpush3.msra.mxu0 %v3091_v18 }
0x10c9   : > { %4210 = vmatprep.subr.mxu0 %v3090_v46 }
0x10ca   : > { %4211 = vmatpush3.msra.mxu0 %v3090_v46 }
0x10cb   : > { %4212 = vmatprep.subr.mxu0 %v3089_v38 }
0x10cc   : > { %4213 = vmatpush3.msra.mxu0 %v3089_v38 }
0x10cd   : > { %4214 = vmatprep.subr.mxu0 %v3088_v20 }
0x10ce   : > { %4215 = vmatpush3.msra.mxu0 %v3088_v20 }
0x10cf   : > { %4216 = vmatprep.subr.mxu0 %v3087_v50 }
0x10d0   : > { %4217 = vmatpush3.msra.mxu0 %v3087_v50 }
0x10d1   : > { %4218 = vmatprep.subr.mxu0 %v3086_v54 }
0x10d2   : > { %4219 = vmatpush3.msra.mxu0 %v3086_v54 }
0x117b   : > { %v4172_v25 = vpop.f32.mrf.mxu0 }
0x117c   : > { %v2793_v55 = vadd.f32 %v4172_v25, %v3720_v24  ;;  %v3084_v25 = vld [vmem:[#allocation2 + $0x1a0] sm:$0xff] }
0x117d   : > { %v2758_v31 = vpop.f32.mrf.mxu0 }
0x117e   : > { %v2792_v32 = vadd.f32 %v3720_v24, %v2758_v31  ;;  %v2829_v33 = vadd.f32 %v2793_v55, %v4843_v51  ;;  %v3083_v55 = vld [vmem:[#allocation2 + $0x198] sm:$0xff]  ;;  %v3082_v31 = vld [vmem:[#allocation2 + $0x190] sm:$0xff] }
0x117f   : > { %v4175_v41 = vpop.f32.mrf.mxu0 }
0x1180   : > { %v2867_v27 = vsel %vm700_vm2, %v2829_v33, 0.0  ;;  %v2828_v7 = vadd.f32 %v2792_v32, %v4841_v6  ;;  %v2795_v52 = vadd.f32 %v4175_v41, %v3720_v24  ;;  %v4988_v32 = vld [vmem:[%s5097_s5 + $0xd] ss:$0 sm:$0xff] }
0x1181   : > { %2868 = vadd.xlane.f32.xlu0 %v2867_v27  ;;  %v2768_v15 = vpop.f32.mrf.mxu0 }
0x1182   : > { %v2864_v29 = vsel %vm700_vm2, %v2828_v7, 0.0  ;;  %v2794_v63 = vadd.f32 %v3720_v24, %v2768_v15 }
0x1183   : > { %2865 = vadd.xlane.f32.xlu1 %v2864_v29  ;;  %v4178_v44 = vpop.f32.mrf.mxu0 }
0x1184   : > { %v2797_v0 = vadd.f32 %v4178_v44, %v3720_v24 }
0x1185   : > { %v2778_v53 = vpop.f32.mrf.mxu0 }
0x1186   : > { %v2796_v11 = vadd.f32 %v3720_v24, %v2778_v53  ;;  %v3085_v24 = vld [vmem:[#allocation2 + $0x1a8] sm:$0xff] }
0x1187   : > { %4220 = vmatprep.subr.mxu0 %v3085_v24 }
0x1188   : > { %4221 = vmatpush3.msra.mxu0 %v3085_v24 }
0x1189   : > { %4222 = vmatprep.subr.mxu0 %v3084_v25 }
0x118a   : > { %4223 = vmatpush3.msra.mxu0 %v3084_v25  ;;  %v3274_v25 = vld [vmem:[#allocation2 + $0x228] sm:$0xff] }
0x118b   : > { %4224 = vmatprep.subr.mxu0 %v3083_v55 }
0x118c   : > { %4225 = vmatpush3.msra.mxu0 %v3083_v55  ;;  %v3273_v55 = vld [vmem:[#allocation2 + $0x220] sm:$0xff] }
0x118d   : > { %4226 = vmatprep.subr.mxu0 %v3082_v31 }
0x118e   : > { %4227 = vmatpush3.msra.mxu0 %v3082_v31  ;;  %v3272_v31 = vld [vmem:[#allocation2 + $0x218] sm:$0xff] }
0x120a   : > { %v2869_v22 = vpop.xlane.xlu0 %2868 }
0x120b   : > { %v2883_v26 = vmul.f32 0.03125, %v2869_v22 }
0x120c   : > { %v2866_v35 = vpop.xlane.xlu1 %2865 }
0x120d   : > { %v4952_v57 = vsub.f32 %v2829_v33, %v2883_v26  ;;  %v2882_v36 = vmul.f32 0.03125, %v2866_v35  ;;  %v3730_v35 = vld [vmem:[%s5097_s5 + $0xe] ss:$0 sm:$0xff] }
0x120f   : > { %v4954_v39 = vsub.f32 %v2828_v7, %v2882_v36  ;;  %v2895_v40 = vmul.f32 %v4952_v57, %v4952_v57 }
0x1211   : > { %v2903_v51 = vsel %vm700_vm2, %v2895_v40, 0.0  ;;  %v2894_v6 = vmul.f32 %v4954_v39, %v4954_v39 }
0x1212   : > { %2904 = vadd.xlane.f32.xlu1 %v2903_v51 }
0x1213   : > { %v2900_v34 = vsel %vm700_vm2, %v2894_v6, 0.0 }
0x1214   : > { %2901 = vadd.xlane.f32.xlu0 %v2900_v34 }
0x1223   : > { %2810 = vrot.lane.b32.xlu1 %v2795_v52, %s4420_s27 }
0x1227   : > { %2812 = vrot.lane.b32.xlu1 %v2796_v11, %s4420_s27 }
0x122a   : > { %2808 = vrot.lane.b32.xlu0 %v2794_v63, %s4420_s27 }
0x122e   : > { %2814 = vrot.lane.b32.xlu0 %v2797_v0, %s4420_s27 }
0x129b   : > { %v2905_v56 = vpop.xlane.xlu1 %2904 }
0x129c   : > { %v2919_v58 = vmul.f32 0.03125, %v2905_v56 }
0x129d   : > { %v2902_v59 = vpop.xlane.xlu0 %2901 }
0x129e   : > { %v2925_v1 = vadd.f32 1e-05, %v2919_v58  ;;  %v2918_v2 = vmul.f32 0.03125, %v2902_v59 }
0x12a0   : > { %4361 = vrsqrt.f32 %v2925_v1  ;;  %v2924_v47 = vadd.f32 1e-05, %v2918_v2 }
0x12a1   : > { %v2809_v40 = vpop.permute.xlu0 %2808 }
0x12a2   : > { %4363 = vrsqrt.f32 %v2924_v47  ;;  %v2830_v41 = vadd.f32 %v2809_v40, %v4865_v16 }
0x12a4   : > { %v2870_v62 = vsel %vm700_vm2, %v2830_v41, 0.0 }
0x12a5   : > { %v2815_v63 = vpop.permute.xlu0 %2814 }
0x12a6   : > { %v2833_v4 = vadd.f32 %v2815_v63, %v4875_v37 }
0x12a8   : > { %v2879_v9 = vsel %vm700_vm2, %v2833_v4, 0.0 }
0x12ad   : > { %v4362_v3 = vpop.eup %4361 }
0x12ae   : > { %v2937_v21 = vmul.f32 %v4362_v3, %v4952_v57  ;;  %v2811_v57 = vpop.permute.xlu1 %2810 }
0x12af   : > { %v4364_v60 = vpop.eup %4363  ;;  %v2831_v53 = vadd.f32 %v2811_v57, %v4867_v8 }
0x12b0   : > { %v2936_v48 = vmul.f32 %v4364_v60, %v4954_v39  ;;  %v2943_v43 = vmul.f32 %v4971_v42, %v2937_v21 }
0x12b1   : > { %v2873_v16 = vsel %vm700_vm2, %v2831_v53, 0.0 }
0x12b2   : > { %v2942_v61 = vmul.f32 %v4971_v42, %v2936_v48  ;;  %v2949_v12 = vadd.f32 %v4978_v23, %v2943_v43  ;;  %v2813_v52 = vpop.permute.xlu1 %2812 }
0x12b3   : > { %v2832_v0 = vadd.f32 %v2813_v52, %v4873_v19 }
0x12b4   : > { %v2948_v45 = vadd.f32 %v4978_v23, %v2942_v61 }
0x12b5   : > { %v2876_v5 = vsel %vm700_vm2, %v2832_v0, 0.0 }
0x12b6   : > { %4187 = vmatprep.mubr.msk.f32.mxu1 %vm700_vm2, %v2948_v45 }
0x12b7   : > { %4188 = vmatmul.mubr.msk.f32.vlgmr.msra.gmra.mxu1 %vm700_vm2, %v2949_v12 }
0x12b8   : > { %4238 = vmatpush3.msra.mxu1 %v3274_v25 }
0x12b9   : > { %4239 = vmatprep.subr.mxu1 %v4419_v49 }
0x12ba   : > { %4240 = vmatpush3.msra.mxu1 %v3273_v55 }
0x12bb   : > { %4241 = vmatprep.subr.mxu1 %v4419_v49 }
0x12bc   : > { %4242 = vmatpush3.msra.mxu1 %v3272_v31 }
0x12bd   : > { %4243 = vmatprep.subr.mxu1 %v4419_v49 }
0x1377   : > { %v4189_v33 = vpop.f32.mrf.mxu1 }
0x1378   : > { %v3053_v27 = vadd.f32 %v4189_v33, %v4988_v32  ;;  %v3271_v33 = vld [vmem:[#allocation2 + $0x210] sm:$0xff] }
0x1379   : > { %v3047_v7 = vpop.f32.mrf.mxu1  ;;  %4244 = vmatpush3.msra.mxu1 %v3271_v33 }
0x137a   : > { %v3048_v29 = vadd.f32 %v4988_v32, %v3047_v7  ;;  %v3077_v26 = vmax.f32 %v3053_v27, 0.0  ;;  %4248 = vmatprep.subr.mxu1 %v4419_v49 }
0x137c   : > { %v3076_v22 = vmax.f32 %v3048_v29, 0.0 }
0x137e   : > { %4228 = vmatprep.mubr.f32.mxu0 %v3076_v22 }
0x137f   : > { %4229 = vmatmul.mubr.f32.vlgmr.msra.gmra.mxu0 %v3077_v26 }
0x143f   : > { %v4230_v36 = vpop.f32.mrf.mxu0 }
0x1440   : > { %v3195_v39 = vadd.f32 %v4230_v36, %v3730_v35 }
0x1441   : > { %v3164_v51 = vpop.f32.mrf.mxu0 }
0x1442   : > { %v3194_v6 = vadd.f32 %v3730_v35, %v3164_v51  ;;  %v3209_v34 = vadd.f32 %v3195_v39, %v2949_v12 }
0x1444   : > { %v3233_v15 = vsel %vm700_vm2, %v3209_v34, 0.0  ;;  %v3208_v44 = vadd.f32 %v3194_v6, %v2948_v45 }
0x1445   : > { %3234 = vadd.xlane.f32.xlu0 %v3233_v15 }
0x1446   : > { %v3230_v11 = vsel %vm700_vm2, %v3208_v44, 0.0 }
0x1447   : > { %3231 = vadd.xlane.f32.xlu1 %v3230_v11 }
0x1449   : > { %2871 = vadd.xlane.f32.xlu0 %v2870_v62 }
0x144b   : > { %2874 = vadd.xlane.f32.xlu1 %v2873_v16 }
0x144d   : > { %2877 = vadd.xlane.f32.xlu0 %v2876_v5 }
0x144f   : > { %2880 = vadd.xlane.f32.xlu1 %v2879_v9 }
0x14ce   : > { %v3235_v8 = vpop.xlane.xlu0 %3234 }
0x14cf   : > { %v3237_v10 = vmul.f32 0.03125, %v3235_v8 }
0x14d0   : > { %v3232_v13 = vpop.xlane.xlu1 %3231 }
0x14d1   : > { %v5005_v14 = vsub.f32 %v3209_v34, %v3237_v10  ;;  %v3236_v19 = vmul.f32 0.03125, %v3232_v13 }
0x14d2   : > { %v2872_v30 = vpop.xlane.xlu0 %2871 }
0x14d3   : > { %v5007_v17 = vsub.f32 %v3208_v44, %v3236_v19  ;;  %v2884_v28 = vmul.f32 0.03125, %v2872_v30  ;;  %v3241_v37 = vmul.f32 %v5005_v14, %v5005_v14 }
0x14d4   : > { %v2875_v18 = vpop.xlane.xlu1 %2874 }
0x14d5   : > { %v5011_v46 = vsub.f32 %v2830_v41, %v2884_v28  ;;  %v2885_v38 = vmul.f32 0.03125, %v2875_v18  ;;  %v3245_v20 = vsel %vm700_vm2, %v3241_v37, 0.0  ;;  %v3240_v50 = vmul.f32 %v5007_v17, %v5007_v17 }
0x14d6   : > { %3246 = vadd.xlane.f32.xlu1 %v3245_v20  ;;  %v2878_v54 = vpop.xlane.xlu0 %2877 }
0x14d7   : > { %v5016_v56 = vsub.f32 %v2831_v53, %v2885_v38  ;;  %v2886_v58 = vmul.f32 0.03125, %v2878_v54  ;;  %v3242_v59 = vsel %vm700_vm2, %v3240_v50, 0.0  ;;  %v2896_v1 = vmul.f32 %v5011_v46, %v5011_v46  ;;  %v3731_v53 = vld [vmem:[%s5097_s5 + $0xf] ss:$0 sm:$0xff] }
0x14d8   : > { %3243 = vadd.xlane.f32.xlu0 %v3242_v59  ;;  %v2881_v2 = vpop.xlane.xlu1 %2880 }
0x14d9   : > { %v5021_v47 = vsub.f32 %v2832_v0, %v2886_v58  ;;  %v2887_v3 = vmul.f32 0.03125, %v2881_v2  ;;  %v2897_v21 = vmul.f32 %v5016_v56, %v5016_v56  ;;  %v2906_v48 = vsel %vm700_vm2, %v2896_v1, 0.0  ;;  %v3732_v0 = vld [vmem:[%s5097_s5 + $0x10] ss:$0 sm:$0xff] }
0x14db   : > { %v5025_v60 = vsub.f32 %v2833_v4, %v2887_v3  ;;  %v2909_v43 = vsel %vm700_vm2, %v2897_v21, 0.0  ;;  %v2898_v61 = vmul.f32 %v5021_v47, %v5021_v47 }
0x14dc   : > { %2907 = vadd.xlane.f32.xlu0 %v2906_v48  ;;  %2910 = vadd.xlane.f32.xlu1 %v2909_v43 }
0x14dd   : > { %v2899_v45 = vmul.f32 %v5025_v60, %v5025_v60  ;;  %v2912_v12 = vsel %vm700_vm2, %v2898_v61, 0.0 }
0x14df   : > { %v2915_v24 = vsel %vm700_vm2, %v2899_v45, 0.0 }
0x14e0   : > { %2913 = vadd.xlane.f32.xlu0 %v2912_v12  ;;  %2916 = vadd.xlane.f32.xlu1 %v2915_v24  ;;  %v3351_v12 = vld [vmem:[#allocation2 + $0x238] sm:$0xff]  ;;  %v3350_v24 = vld [vmem:[#allocation2 + $0x230] sm:$0xff] }
0x14f1   : > { %2855 = vrot.lane.b32.xlu1 %v4978_v23, %s4420_s27 }
0x14f6   : > { %2841 = vrot.lane.b32.xlu0 %v4971_v42, %s4420_s27 }
0x155f   : > { %v3247_v23 = vpop.xlane.xlu1 %3246 }
0x1560   : > { %v3249_v27 = vmul.f32 0.03125, %v3247_v23 }
0x1561   : > { %v3244_v7 = vpop.xlane.xlu0 %3243 }
0x1562   : > { %v3251_v42 = vadd.f32 1e-05, %v3249_v27  ;;  %v3248_v29 = vmul.f32 0.03125, %v3244_v7 }
0x1564   : > { %4365 = vrsqrt.f32 %v3251_v42  ;;  %v3250_v22 = vadd.f32 1e-05, %v3248_v29 }
0x1565   : > { %v2908_v26 = vpop.xlane.xlu0 %2907  ;;  %v2911_v35 = vpop.xlane.xlu1 %2910 }
0x1566   : > { %4367 = vrsqrt.f32 %v3250_v22  ;;  %v2920_v57 = vmul.f32 0.03125, %v2908_v26  ;;  %v2921_v36 = vmul.f32 0.03125, %v2911_v35 }
0x1568   : > { %v2926_v39 = vadd.f32 1e-05, %v2920_v57  ;;  %v2927_v40 = vadd.f32 1e-05, %v2921_v36  ;;  %v3275_v57 = vld [vmem:[%s5097_s5 + $0x11] sm:$0x1] }
0x1569   : > { %v2914_v51 = vpop.xlane.xlu0 %2913  ;;  %v2917_v6 = vpop.xlane.xlu1 %2916 }
0x156a   : > { %4369 = vrsqrt.f32 %v2926_v39  ;;  %v2922_v34 = vmul.f32 0.03125, %v2914_v51  ;;  %v2923_v41 = vmul.f32 0.03125, %v2917_v6 }
0x156b   : > { %4371 = vrsqrt.f32 %v2927_v40 }
0x156c   : > { %v2928_v15 = vadd.f32 1e-05, %v2922_v34  ;;  %v2929_v44 = vadd.f32 1e-05, %v2923_v41 }
0x156d   : > { %v2842_v8 = vpop.permute.xlu0 %2841  ;;  %v2856_v28 = vpop.permute.xlu1 %2855 }
0x156e   : > { %4373 = vrsqrt.f32 %v2928_v15 }
0x156f   : > { %4375 = vrsqrt.f32 %v2929_v44  ;;  %v3352_v44 = vld [vmem:[%s5097_s5 + $0x12] sm:$0x1] }
0x1571   : > { %v4366_v52 = vpop.eup %4365 }
0x1572   : > { %v3255_v11 = vmul.f32 %v4366_v52, %v5005_v14 }
0x1573   : > { %v4368_v63 = vpop.eup %4367 }
0x1574   : > { %v3257_v62 = vmul.f32 %v3731_v53, %v3255_v11  ;;  %v3254_v4 = vmul.f32 %v4368_v63, %v5007_v17 }
0x1576   : > { %v3259_v16 = vadd.f32 %v3732_v0, %v3257_v62  ;;  %v3256_v5 = vmul.f32 %v3731_v53, %v3254_v4 }
0x1577   : > { %v4370_v9 = vpop.eup %4369 }
0x1578   : > { %v4372_v10 = vpop.eup %4371  ;;  %v3258_v13 = vadd.f32 %v3732_v0, %v3256_v5  ;;  %v2938_v19 = vmul.f32 %v4370_v9, %v5011_v46  ;;  %v3261_v14 = vsel %vm700_vm2, %v3259_v16, 0.0 }
0x1579   : > { %v2939_v30 = vmul.f32 %v4372_v10, %v5016_v56 }
0x157a   : > { %v3260_v37 = vsel %vm700_vm2, %v3258_v13, 0.0  ;;  %v2944_v18 = vmul.f32 %v2938_v19, %v2842_v8 }
0x157b   : > { %v4374_v38 = vpop.eup %4373  ;;  %v3262_v20 = vadd.f32 %v3261_v14, %v3260_v37  ;;  %v2945_v50 = vmul.f32 %v2939_v30, %v2842_v8 }
0x157c   : > { %v4376_v17 = vpop.eup %4375  ;;  %v2940_v54 = vmul.f32 %v4374_v38, %v5021_v47  ;;  %v2950_v58 = vadd.f32 %v2944_v18, %v2856_v28 }
0x157d   : > { %v2941_v59 = vmul.f32 %v4376_v17, %v5025_v60  ;;  %v2951_v1 = vadd.f32 %v2945_v50, %v2856_v28  ;;  %v3263_v2 = vrot.slane %v3262_v20, 4 }
0x157e   : > { %v2946_v46 = vmul.f32 %v2940_v54, %v2842_v8  ;;  %4190 = vmatprep.mubr.msk.f32.mxu1 %vm700_vm2, %v2950_v58 }
0x157f   : > { %v2947_v56 = vmul.f32 %v2941_v59, %v2842_v8  ;;  %4191 = vmatmul.mubr.msk.f32.gmra.mxu1 %vm700_vm2, %v2951_v1  ;;  %v3264_v3 = vadd.f32 %v3263_v2, %v3262_v20 }
0x1580   : > { %v2952_v21 = vadd.f32 %v2946_v46, %v2856_v28 }
0x1581   : > { %v2953_v48 = vadd.f32 %v2947_v56, %v2856_v28  ;;  %v3265_v43 = vrot.slane %v3264_v3, 2 }
0x1582   : > { %4193 = vmatprep.mubr.msk.f32.mxu1 %vm700_vm2, %v2952_v21 }
0x1583   : > { %4194 = vmatmul.mubr.msk.f32.gmra.mxu1 %vm700_vm2, %v2953_v48  ;;  %v3266_v47 = vadd.f32 %v3265_v43, %v3264_v3 }
0x1584   : > { %4245 = vmatprep.mubr.msk.f32.mxu1 %vm4423_vm1, %v4419_v49 }
0x1585   : > { %v3267_v60 = vrot.slane %v3266_v47, 1 }
0x1587   : > { %v3268_v61 = vadd.f32 %v3267_v60, %v3266_v47 }
0x1589   : > { %v3270_v45 = vmul.f32 0.0625, %v3268_v61 }
0x158b   : > { %4246 = vmatmul.mubr.msk.f32.vlgmr.msra.gmra.mxu1 %vm700_vm2, %v3270_v45  ;;  %vm3502_vm2 = vcmask 0  }
0x158c   : > { %4252 = vmatprep.mubr.msk.f32.mxu1 %vm4423_vm1, %v4419_v49  ;;  %4249 = vmatpush3.msra.mxu1 %v3351_v12 }
0x158d   : > { %4250 = vmatprep.subr.mxu1 %v4419_v49 }
0x158e   : > { %4251 = vmatpush3.msra.mxu1 %v3350_v24 }
0x158f   : > { %4255 = vmatprep.subr.mxu1 %v4419_v49 }
0x163f   : > { %v4192_v25 = vpop.f32.mrf.mxu1 }
0x1640   : > { %v3063_v55 = vadd.f32 %v4192_v25, %v4988_v32 }
0x1641   : > { %v3057_v31 = vpop.f32.mrf.mxu1 }
0x1642   : > { %v3058_v33 = vadd.f32 %v4988_v32, %v3057_v31  ;;  %v3079_v7 = vmax.f32 %v3063_v55, 0.0 }
0x1643   : > { %v4195_v23 = vpop.f32.mrf.mxu1 }
0x1644   : > { %v3078_v27 = vmax.f32 %v3058_v33, 0.0  ;;  %v3073_v42 = vadd.f32 %v4195_v23, %v4988_v32 }
0x1645   : > { %v3067_v29 = vpop.f32.mrf.mxu1 }
0x1646   : > { %v3068_v22 = vadd.f32 %v4988_v32, %v3067_v29  ;;  %4231 = vmatprep.mubr.f32.mxu0 %v3078_v27  ;;  %v3081_v35 = vmax.f32 %v3073_v42, 0.0  ;;  %v3427_v32 = vld [vmem:[#allocation2 + $0x240] sm:$0xff] }
0x1647   : > { %4232 = vmatmul.mubr.f32.gmra.mxu0 %v3079_v7 }
0x1648   : > { %v3080_v26 = vmax.f32 %v3068_v22, 0.0 }
0x164a   : > { %4234 = vmatprep.mubr.f32.mxu0 %v3080_v26 }
0x164b   : > { %4235 = vmatmul.mubr.f32.gmra.mxu0 %v3081_v35  ;;  %v3345_v36 = vpop.f32.mrf.mxu1 }
0x164c   : > { %v3346_v39 = vadd.f32 %v3345_v36, %v3275_v57 }
0x164d   : > { %v4247_v40 = vpop.f32.mrf.mxu1 }
0x164e   : > { %v3349_v51 = vmax.f32 %v3346_v39, 0.0 }
0x1650   : > { %4253 = vmatmul.mubr.msk.f32.vlgmr.msra.gmra.mxu1 %vm915_vm4, %v3349_v51 }
0x1651   : > { %4257 = vmatprep.mubr.msk.f32.mxu1 %vm4423_vm1, %v4419_v49  ;;  %4256 = vmatpush3.msra.mxu1 %v3427_v32  ;;  %v3428_v49 = vld [vmem:[%s5097_s5 + $0x13] sm:$0x1] }
0x1707   : > { %v4233_v6 = vpop.f32.mrf.mxu0 }
0x1709   : > { %v3174_v34 = vpop.f32.mrf.mxu0 }
0x170b   : > { %v4236_v41 = vpop.f32.mrf.mxu0 }
0x170d   : > { %v3182_v15 = vpop.f32.mrf.mxu0 }
0x1710   : > { %v3422_v52 = vpop.f32.mrf.mxu1 }
0x1711   : > { %v3423_v53 = vadd.f32 %v3422_v52, %v3352_v44 }
0x1712   : > { %v4254_v11 = vpop.f32.mrf.mxu1 }
0x1713   : > { %v3426_v63 = vmax.f32 %v3423_v53, 0.0 }
0x1715   : > { %4258 = vmatmul.mubr.msk.f32.vlgmr.msra.gmra.mxu1 %vm425_vm0, %v3426_v63 }
0x17d5   : > { %v3498_v0 = vpop.f32.mrf.mxu1 }
0x17d6   : > { %v3499_v62 = vadd.f32 %v3498_v0, %v3428_v49 }
0x17d7   : > { %v4259_v4 = vpop.f32.mrf.mxu1 }
0x17d8   : > { %3503 = vst.msk [vmem:[%s322_s23] sm:$0x1] %vm3502_vm2, %v3499_v62 }
0x17d9 PF: > { %s17_s21 = sadd.s32 1, %s4413_s21  }
0x17da   : > { %p14_p1 = scmp.ge.s32.totalorder %s17_s21, 4  }
0x17dc   :  { %16 = sbr.rel (!%p14_p1) target bundleno = 1 (0x1), region = 88 }
0x17e1   :  { %3521 = vsyncpa [#allocation3], 1 }
0x17e2   :  { %3523 = vsyncpa [#allocation3 + $0x1], 1 }

</bundles_post_ra>
